<compile_context>
chip_gen: v5e
topology: v5e:2x2
jax: 0.10.0
libtpu: 0.0.40
codegen_flags: <defaults>
</compile_context>

<pallas_src>
import functools

import jax
import jax.numpy as jnp
import numpy as np
from jax.experimental import pallas as pl
from jax.experimental.pallas import tpu as pltpu


def _res_kernel(w1_ref, b1_ref, w2_ref, b2_ref, x_ref, o_ref, pad_ref, *, C, H, W):
    eps = 1e-5
    HW = H * W
    f32 = jnp.float32

    # Which flat (lane) positions sit on the left / right image edge.
    lane = jax.lax.broadcasted_iota(jnp.int32, (C, HW), 1)
    col = lane % W
    first_col = col == 0
    last_col = col == (W - 1)

    def conv3x3(a, w_ref, b_ref):
        # a: (C, HW) f32.  Row-reflected padded image in a flat scratch:
        #   pad_ref[:, 1 + r*W + w] = a[:, R(r-1)*W + w],  R(-1)=1, R(H)=H-2.
        # One full-width interior store + two reflected-row stores (edges come
        # from register values, not from reading the scratch back).
        pad_ref[:, pl.ds(1 + W, HW)] = a
        pad_ref[:, pl.ds(1, W)] = a[:, W:2 * W]                                 # top    = row 1
        pad_ref[:, pl.ds(1 + (H + 1) * W, W)] = a[:, (H - 2) * W:(H - 1) * W]   # bottom = row H-2

        acc = jnp.zeros((C, HW), f32)
        k = 0
        for dy in (-1, 0, 1):                     # vertical tap offset (ki = dy + 1)
            base = 1 + (1 + dy) * W
            r_m = pad_ref[:, pl.ds(base - 1, HW)]   # raw horizontal shift dx = -1
            r_0 = pad_ref[:, pl.ds(base, HW)]       # dx = 0
            r_p = pad_ref[:, pl.ds(base + 1, HW)]   # raw horizontal shift dx = +1
            taps = (
                jnp.where(first_col, r_p, r_m),     # dx = -1 with left-edge reflection
                r_0,
                jnp.where(last_col, r_m, r_p),      # dx = +1 with right-edge reflection
            )
            for t in taps:
                # Channel contraction on the MXU, f32 accumulation.
                acc = acc + jnp.dot(w_ref[k], t, preferred_element_type=f32)
                k += 1
        return acc + b_ref[...]                     # bias (C, 1) broadcasts over lanes

    def instance_norm(y):
        # InstanceNorm2d defaults: affine=False, eps=1e-5, biased variance.
        inv_n = 1.0 / HW
        mean = jnp.sum(y, axis=-1, keepdims=True) * inv_n
        ex2 = jnp.sum(y * y, axis=-1, keepdims=True) * inv_n
        var = ex2 - mean * mean
        return (y - mean) * jax.lax.rsqrt(var + eps)

    xf = x_ref[...].astype(f32)                     # (C, HW), loaded once, reused for residual
    h1 = jnp.maximum(instance_norm(conv3x3(xf, w1_ref, b1_ref)), 0.0)
    h2 = instance_norm(conv3x3(h1, w2_ref, b2_ref))
    o_ref[...] = jnp.maximum(xf + h2, 0.0).astype(o_ref.dtype)


def residual_network(x, w1, b1, w2, b2):
    N, C, H, W = x.shape
    assert H >= 2 and W >= 2, "ReflectionPad2d(1) requires H, W >= 2"
    HW = H * W

    # Lane-dense layout: flatten spatial dims onto the lane axis (free, row-major
    # bitcast in XLA).  Weights pre-arranged as (9, C_out, C_in) with k = ki*3+kj.
    xf = x.reshape(N, C, HW)
    w1m = jnp.transpose(w1, (2, 3, 0, 1)).reshape(9, C, C).astype(jnp.float32)
    w2m = jnp.transpose(w2, (2, 3, 0, 1)).reshape(9, C, C).astype(jnp.float32)
    b1m = b1.reshape(C, 1).astype(jnp.float32)
    b2m = b2.reshape(C, 1).astype(jnp.float32)

    kernel = functools.partial(_res_kernel, C=C, H=H, W=W)
    out = pl.pallas_call(
        kernel,
        out_shape=jax.ShapeDtypeStruct((N, C, HW), x.dtype),
        grid=(N,),
        in_specs=[
            pl.BlockSpec((9, C, C), lambda n: (0, 0, 0)),        # w1 (VMEM, resident)
            pl.BlockSpec((C, 1), lambda n: (0, 0)),              # b1
            pl.BlockSpec((9, C, C), lambda n: (0, 0, 0)),        # w2
            pl.BlockSpec((C, 1), lambda n: (0, 0)),              # b2
            pl.BlockSpec((None, C, HW), lambda n: (n, 0, 0)),    # x, batch dim squeezed
        ],
        out_specs=pl.BlockSpec((None, C, HW), lambda n: (n, 0, 0)),
        scratch_shapes=[pltpu.VMEM((C, (H + 2) * W + 2), jnp.float32)],
        compiler_params=pltpu.CompilerParams(
            dimension_semantics=("parallel",),
            vmem_limit_bytes=64 * 1024 * 1024,
        ),
    )(w1m, b1m, w2m, b2m, xf)
    return out.reshape(N, C, H, W)


def reference(x, w1, b1, w2, b2):
    """Pure-JAX reference (elementwise math) matching the PyTorch module."""
    N, C, H, W = x.shape

    def layer(a, w, b):
        ap = jnp.pad(a, ((0, 0), (0, 0), (1, 1), (1, 1)), mode="reflect")
        y = jnp.zeros_like(a)
        for ki in range(3):
            for kj in range(3):
                tap = ap[:, :, ki:ki + H, kj:kj + W]                 # (N, Cin, H, W)
                y = y + jnp.sum(tap[:, None] * w[None, :, :, ki, kj, None, None], axis=2)
        y = y + b[None, :, None, None]
        mean = jnp.mean(y, axis=(2, 3), keepdims=True)
        var = jnp.mean((y - mean) ** 2, axis=(2, 3), keepdims=True)
        return (y - mean) / jnp.sqrt(var + 1e-5)

    h = jax.nn.relu(layer(x, w1, b1))
    h = layer(h, w2, b2)
    return jax.nn.relu(x + h)


if __name__ == "__main__":
    N, C, H, W = 2, 4, 16, 16
    key = jax.random.PRNGKey(0)
    kw1, kb1, kw2, kb2, kx = jax.random.split(key, 5)
    w1 = jax.random.normal(kw1, (C, C, 3, 3), jnp.float32) * 0.2
    b1 = jax.random.normal(kb1, (C,), jnp.float32) * 0.1
    w2 = jax.random.normal(kw2, (C, C, 3, 3), jnp.float32) * 0.2
    b2 = jax.random.normal(kb2, (C,), jnp.float32) * 0.1
    x = jax.random.normal(kx, (N, C, H, W), jnp.float32)

    out = residual_network(x, w1, b1, w2, b2)
    out = jax.block_until_ready(out)

    ref = reference(x, w1, b1, w2, b2)
    assert out.shape == (N, C, H, W)
    np.testing.assert_allclose(np.asarray(out), np.asarray(ref), rtol=1e-4, atol=1e-4)
    print("KERNEL_OK")
</pallas_src>

<mosaic_0001>
module attributes {stable_mosaic.version = 11 : i64} {
  func.func @_res_kernel(%arg0: i32, %arg1: memref<9x4x4xf32, #tpu.memory_space<vmem>>, %arg2: memref<4x1xf32, #tpu.memory_space<vmem>>, %arg3: memref<9x4x4xf32, #tpu.memory_space<vmem>>, %arg4: memref<4x1xf32, #tpu.memory_space<vmem>>, %arg5: memref<1x4x256xf32, #tpu.memory_space<vmem>>, %arg6: memref<1x4x256xf32, #tpu.memory_space<vmem>>, %arg7: memref<4x290xf32, #tpu.memory_space<vmem>>) attributes {dimension_semantics = [#tpu.dimension_semantics<parallel>], iteration_bounds = array<i64: 2>, scalar_prefetch = 0 : i64, scratch_operands = 1 : i64, tpu.core_type = #tpu.core_type<tc>, window_params = [{pipeline_mode = #tpu.pipeline_mode<synchronous>, transform_indices = @transform_0, window_bounds = array<i64: 9, 4, 4>}, {pipeline_mode = #tpu.pipeline_mode<synchronous>, transform_indices = @transform_1, window_bounds = array<i64: 4, 1>}, {pipeline_mode = #tpu.pipeline_mode<synchronous>, transform_indices = @transform_2, window_bounds = array<i64: 9, 4, 4>}, {pipeline_mode = #tpu.pipeline_mode<synchronous>, transform_indices = @transform_3, window_bounds = array<i64: 4, 1>}, {transform_indices = @transform_4, window_bounds = array<i64: 1, 4, 256>}, {transform_indices = @transform_5, window_bounds = array<i64: 1, 4, 256>}]} {
    %0 = tpu.iota {dimensions = array<i32: 1>} : vector<4x256xi32>
    %c16_i32 = arith.constant 16 : i32
    %c0_i32 = arith.constant 0 : i32
    %1 = arith.cmpi eq, %c16_i32, %c0_i32 : i32
    %c1_i32 = arith.constant 1 : i32
    %2 = arith.select %1, %c1_i32, %c16_i32 : i32
    %3 = vector.broadcast %2 : i32 to vector<4x256xi32>
    %4 = arith.remsi %0, %3 : vector<4x256xi32>
    %c0_i32_0 = arith.constant 0 : i32
    %5 = vector.broadcast %c0_i32_0 : i32 to vector<4x256xi32>
    %6 = arith.cmpi ne, %4, %5 : vector<4x256xi32>
    %c0_i32_1 = arith.constant 0 : i32
    %7 = vector.broadcast %c0_i32_1 : i32 to vector<4x256xi32>
    %8 = arith.cmpi slt, %4, %7 : vector<4x256xi32>
    %c0_i32_2 = arith.constant 0 : i32
    %9 = arith.cmpi slt, %2, %c0_i32_2 : i32
    %10 = vector.broadcast %9 : i1 to vector<4x256xi1>
    %11 = vector.broadcast %10 : vector<4x256xi1> to vector<4x256xi1>
    %12 = arith.xori %8, %11 : vector<4x256xi1>
    %13 = arith.andi %12, %6 : vector<4x256xi1>
    %14 = vector.broadcast %2 : i32 to vector<4x256xi32>
    %15 = arith.addi %4, %14 : vector<4x256xi32>
    %16 = arith.select %13, %15, %4 : vector<4x256xi1>, vector<4x256xi32>
    %c0_i32_3 = arith.constant 0 : i32
    %17 = vector.broadcast %c0_i32_3 : i32 to vector<4x256xi32>
    %18 = arith.cmpi eq, %16, %17 : vector<4x256xi32>
    %c15_i32 = arith.constant 15 : i32
    %19 = vector.broadcast %c15_i32 : i32 to vector<4x256xi32>
    %20 = arith.cmpi eq, %16, %19 : vector<4x256xi32>
    %c0 = arith.constant 0 : index
    %c0_4 = arith.constant 0 : index
    %c0_5 = arith.constant 0 : index
    %21 = vector.load %arg5[%c0, %c0_4, %c0_5] : memref<1x4x256xf32, #tpu.memory_space<vmem>>, vector<1x4x256xf32>
    %22 = vector.shape_cast %21 : vector<1x4x256xf32> to vector<4x256xf32>
    %c0_6 = arith.constant 0 : index
    %c17 = arith.constant 17 : index
    %23 = vector.load %arg7[%c0_6, %c17] : memref<4x290xf32, #tpu.memory_space<vmem>>, vector<4x256xf32>
    tpu.vector_store %arg7[%c0_6, %c17], %22 {strides = array<i32>} : memref<4x290xf32, #tpu.memory_space<vmem>>, vector<4x256xf32>,
    %24 = vector.extract_strided_slice %22 {offsets = [0, 16], sizes = [4, 16], strides = [1, 1]} : vector<4x256xf32> to vector<4x16xf32>
    %c0_7 = arith.constant 0 : index
    %c1 = arith.constant 1 : index
    %25 = vector.load %arg7[%c0_7, %c1] : memref<4x290xf32, #tpu.memory_space<vmem>>, vector<4x16xf32>
    tpu.vector_store %arg7[%c0_7, %c1], %24 {strides = array<i32>} : memref<4x290xf32, #tpu.memory_space<vmem>>, vector<4x16xf32>,
    %26 = vector.extract_strided_slice %22 {offsets = [0, 224], sizes = [4, 16], strides = [1, 1]} : vector<4x256xf32> to vector<4x16xf32>
    %c0_8 = arith.constant 0 : index
    %c273 = arith.constant 273 : index
    %27 = vector.load %arg7[%c0_8, %c273] : memref<4x290xf32, #tpu.memory_space<vmem>>, vector<4x16xf32>
    tpu.vector_store %arg7[%c0_8, %c273], %26 {strides = array<i32>} : memref<4x290xf32, #tpu.memory_space<vmem>>, vector<4x16xf32>,
    %cst = arith.constant 0.000000e+00 : f32
    %28 = vector.broadcast %cst : f32 to vector<4x256xf32>
    %c0_9 = arith.constant 0 : index
    %c0_10 = arith.constant 0 : index
    %29 = vector.load %arg7[%c0_9, %c0_10] : memref<4x290xf32, #tpu.memory_space<vmem>>, vector<4x256xf32>
    %c0_11 = arith.constant 0 : index
    %c1_12 = arith.constant 1 : index
    %30 = vector.load %arg7[%c0_11, %c1_12] : memref<4x290xf32, #tpu.memory_space<vmem>>, vector<4x256xf32>
    %c0_13 = arith.constant 0 : index
    %c2 = arith.constant 2 : index
    %31 = vector.load %arg7[%c0_13, %c2] : memref<4x290xf32, #tpu.memory_space<vmem>>, vector<4x256xf32>
    %32 = arith.select %18, %31, %29 : vector<4x256xi1>, vector<4x256xf32>
    %33 = arith.select %20, %29, %31 : vector<4x256xi1>, vector<4x256xf32>
    %c0_14 = arith.constant 0 : index
    %c0_15 = arith.constant 0 : index
    %c0_16 = arith.constant 0 : index
    %34 = vector.load %arg1[%c0_14, %c0_15, %c0_16] : memref<9x4x4xf32, #tpu.memory_space<vmem>>, vector<1x4x4xf32>
    %35 = vector.shape_cast %34 : vector<1x4x4xf32> to vector<4x4xf32>
    %cst_17 = arith.constant dense<0.000000e+00> : vector<4x256xf32>
    %36 = tpu.matmul %35, %32, %cst_17 {dimension_numbers = #tpu.dot_dimension_numbers<[1], [0], [0], [1], [0, 0, 1, 1], [], []>} : vector<4x4xf32>, vector<4x256xf32>, vector<4x256xf32> -> vector<4x256xf32>
    %37 = arith.addf %28, %36 : vector<4x256xf32>
    %c1_18 = arith.constant 1 : index
    %c0_19 = arith.constant 0 : index
    %c0_20 = arith.constant 0 : index
    %38 = vector.load %arg1[%c1_18, %c0_19, %c0_20] : memref<9x4x4xf32, #tpu.memory_space<vmem>>, vector<1x4x4xf32>
    %39 = vector.shape_cast %38 : vector<1x4x4xf32> to vector<4x4xf32>
    %cst_21 = arith.constant dense<0.000000e+00> : vector<4x256xf32>
    %40 = tpu.matmul %39, %30, %cst_21 {dimension_numbers = #tpu.dot_dimension_numbers<[1], [0], [0], [1], [0, 0, 1, 1], [], []>} : vector<4x4xf32>, vector<4x256xf32>, vector<4x256xf32> -> vector<4x256xf32>
    %41 = arith.addf %37, %40 : vector<4x256xf32>
    %c2_22 = arith.constant 2 : index
    %c0_23 = arith.constant 0 : index
    %c0_24 = arith.constant 0 : index
    %42 = vector.load %arg1[%c2_22, %c0_23, %c0_24] : memref<9x4x4xf32, #tpu.memory_space<vmem>>, vector<1x4x4xf32>
    %43 = vector.shape_cast %42 : vector<1x4x4xf32> to vector<4x4xf32>
    %cst_25 = arith.constant dense<0.000000e+00> : vector<4x256xf32>
    %44 = tpu.matmul %43, %33, %cst_25 {dimension_numbers = #tpu.dot_dimension_numbers<[1], [0], [0], [1], [0, 0, 1, 1], [], []>} : vector<4x4xf32>, vector<4x256xf32>, vector<4x256xf32> -> vector<4x256xf32>
    %45 = arith.addf %41, %44 : vector<4x256xf32>
    %c0_26 = arith.constant 0 : index
    %c16 = arith.constant 16 : index
    %46 = vector.load %arg7[%c0_26, %c16] : memref<4x290xf32, #tpu.memory_space<vmem>>, vector<4x256xf32>
    %c0_27 = arith.constant 0 : index
    %c17_28 = arith.constant 17 : index
    %47 = vector.load %arg7[%c0_27, %c17_28] : memref<4x290xf32, #tpu.memory_space<vmem>>, vector<4x256xf32>
    %c0_29 = arith.constant 0 : index
    %c18 = arith.constant 18 : index
    %48 = vector.load %arg7[%c0_29, %c18] : memref<4x290xf32, #tpu.memory_space<vmem>>, vector<4x256xf32>
    %49 = arith.select %18, %48, %46 : vector<4x256xi1>, vector<4x256xf32>
    %50 = arith.select %20, %46, %48 : vector<4x256xi1>, vector<4x256xf32>
    %c3 = arith.constant 3 : index
    %c0_30 = arith.constant 0 : index
    %c0_31 = arith.constant 0 : index
    %51 = vector.load %arg1[%c3, %c0_30, %c0_31] : memref<9x4x4xf32, #tpu.memory_space<vmem>>, vector<1x4x4xf32>
    %52 = vector.shape_cast %51 : vector<1x4x4xf32> to vector<4x4xf32>
    %cst_32 = arith.constant dense<0.000000e+00> : vector<4x256xf32>
    %53 = tpu.matmul %52, %49, %cst_32 {dimension_numbers = #tpu.dot_dimension_numbers<[1], [0], [0], [1], [0, 0, 1, 1], [], []>} : vector<4x4xf32>, vector<4x256xf32>, vector<4x256xf32> -> vector<4x256xf32>
    %54 = arith.addf %45, %53 : vector<4x256xf32>
    %c4 = arith.constant 4 : index
    %c0_33 = arith.constant 0 : index
    %c0_34 = arith.constant 0 : index
    %55 = vector.load %arg1[%c4, %c0_33, %c0_34] : memref<9x4x4xf32, #tpu.memory_space<vmem>>, vector<1x4x4xf32>
    %56 = vector.shape_cast %55 : vector<1x4x4xf32> to vector<4x4xf32>
    %cst_35 = arith.constant dense<0.000000e+00> : vector<4x256xf32>
    %57 = tpu.matmul %56, %47, %cst_35 {dimension_numbers = #tpu.dot_dimension_numbers<[1], [0], [0], [1], [0, 0, 1, 1], [], []>} : vector<4x4xf32>, vector<4x256xf32>, vector<4x256xf32> -> vector<4x256xf32>
    %58 = arith.addf %54, %57 : vector<4x256xf32>
    %c5 = arith.constant 5 : index
    %c0_36 = arith.constant 0 : index
    %c0_37 = arith.constant 0 : index
    %59 = vector.load %arg1[%c5, %c0_36, %c0_37] : memref<9x4x4xf32, #tpu.memory_space<vmem>>, vector<1x4x4xf32>
    %60 = vector.shape_cast %59 : vector<1x4x4xf32> to vector<4x4xf32>
    %cst_38 = arith.constant dense<0.000000e+00> : vector<4x256xf32>
    %61 = tpu.matmul %60, %50, %cst_38 {dimension_numbers = #tpu.dot_dimension_numbers<[1], [0], [0], [1], [0, 0, 1, 1], [], []>} : vector<4x4xf32>, vector<4x256xf32>, vector<4x256xf32> -> vector<4x256xf32>
    %62 = arith.addf %58, %61 : vector<4x256xf32>
    %c0_39 = arith.constant 0 : index
    %c32 = arith.constant 32 : index
    %63 = vector.load %arg7[%c0_39, %c32] : memref<4x290xf32, #tpu.memory_space<vmem>>, vector<4x256xf32>
    %c0_40 = arith.constant 0 : index
    %c33 = arith.constant 33 : index
    %64 = vector.load %arg7[%c0_40, %c33] : memref<4x290xf32, #tpu.memory_space<vmem>>, vector<4x256xf32>
    %c0_41 = arith.constant 0 : index
    %c34 = arith.constant 34 : index
    %65 = vector.load %arg7[%c0_41, %c34] : memref<4x290xf32, #tpu.memory_space<vmem>>, vector<4x256xf32>
    %66 = arith.select %18, %65, %63 : vector<4x256xi1>, vector<4x256xf32>
    %67 = arith.select %20, %63, %65 : vector<4x256xi1>, vector<4x256xf32>
    %c6 = arith.constant 6 : index
    %c0_42 = arith.constant 0 : index
    %c0_43 = arith.constant 0 : index
    %68 = vector.load %arg1[%c6, %c0_42, %c0_43] : memref<9x4x4xf32, #tpu.memory_space<vmem>>, vector<1x4x4xf32>
    %69 = vector.shape_cast %68 : vector<1x4x4xf32> to vector<4x4xf32>
    %cst_44 = arith.constant dense<0.000000e+00> : vector<4x256xf32>
    %70 = tpu.matmul %69, %66, %cst_44 {dimension_numbers = #tpu.dot_dimension_numbers<[1], [0], [0], [1], [0, 0, 1, 1], [], []>} : vector<4x4xf32>, vector<4x256xf32>, vector<4x256xf32> -> vector<4x256xf32>
    %71 = arith.addf %62, %70 : vector<4x256xf32>
    %c7 = arith.constant 7 : index
    %c0_45 = arith.constant 0 : index
    %c0_46 = arith.constant 0 : index
    %72 = vector.load %arg1[%c7, %c0_45, %c0_46] : memref<9x4x4xf32, #tpu.memory_space<vmem>>, vector<1x4x4xf32>
    %73 = vector.shape_cast %72 : vector<1x4x4xf32> to vector<4x4xf32>
    %cst_47 = arith.constant dense<0.000000e+00> : vector<4x256xf32>
    %74 = tpu.matmul %73, %64, %cst_47 {dimension_numbers = #tpu.dot_dimension_numbers<[1], [0], [0], [1], [0, 0, 1, 1], [], []>} : vector<4x4xf32>, vector<4x256xf32>, vector<4x256xf32> -> vector<4x256xf32>
    %75 = arith.addf %71, %74 : vector<4x256xf32>
    %c8 = arith.constant 8 : index
    %c0_48 = arith.constant 0 : index
    %c0_49 = arith.constant 0 : index
    %76 = vector.load %arg1[%c8, %c0_48, %c0_49] : memref<9x4x4xf32, #tpu.memory_space<vmem>>, vector<1x4x4xf32>
    %77 = vector.shape_cast %76 : vector<1x4x4xf32> to vector<4x4xf32>
    %cst_50 = arith.constant dense<0.000000e+00> : vector<4x256xf32>
    %78 = tpu.matmul %77, %67, %cst_50 {dimension_numbers = #tpu.dot_dimension_numbers<[1], [0], [0], [1], [0, 0, 1, 1], [], []>} : vector<4x4xf32>, vector<4x256xf32>, vector<4x256xf32> -> vector<4x256xf32>
    %79 = arith.addf %75, %78 : vector<4x256xf32>
    %c0_51 = arith.constant 0 : index
    %c0_52 = arith.constant 0 : index
    %80 = vector.load %arg2[%c0_51, %c0_52] : memref<4x1xf32, #tpu.memory_space<vmem>>, vector<4x1xf32>
    %81 = vector.broadcast %80 : vector<4x1xf32> to vector<4x256xf32>
    %82 = arith.addf %79, %81 : vector<4x256xf32>
    %cst_53 = arith.constant dense<0.000000e+00> : vector<4xf32>
    %83 = vector.multi_reduction <add>, %82, %cst_53 [1] : vector<4x256xf32> to vector<4xf32>
    %84 = vector.shape_cast %83 : vector<4xf32> to vector<4x1xf32>
    %cst_54 = arith.constant 3.906250e-03 : f32
    %85 = vector.broadcast %cst_54 : f32 to vector<4x1xf32>
    %86 = arith.mulf %84, %85 : vector<4x1xf32>
    %87 = arith.mulf %82, %82 : vector<4x256xf32>
    %cst_55 = arith.constant dense<0.000000e+00> : vector<4xf32>
    %88 = vector.multi_reduction <add>, %87, %cst_55 [1] : vector<4x256xf32> to vector<4xf32>
    %89 = vector.shape_cast %88 : vector<4xf32> to vector<4x1xf32>
    %cst_56 = arith.constant 3.906250e-03 : f32
    %90 = vector.broadcast %cst_56 : f32 to vector<4x1xf32>
    %91 = arith.mulf %89, %90 : vector<4x1xf32>
    %92 = arith.mulf %86, %86 : vector<4x1xf32>
    %93 = arith.subf %91, %92 : vector<4x1xf32>
    %94 = vector.broadcast %86 : vector<4x1xf32> to vector<4x256xf32>
    %95 = arith.subf %82, %94 : vector<4x256xf32>
    %cst_57 = arith.constant 9.99999974E-6 : f32
    %96 = vector.broadcast %cst_57 : f32 to vector<4x1xf32>
    %97 = arith.addf %93, %96 : vector<4x1xf32>
    %98 = math.rsqrt %97 : vector<4x1xf32>
    %99 = vector.broadcast %98 : vector<4x1xf32> to vector<4x256xf32>
    %100 = arith.mulf %95, %99 : vector<4x256xf32>
    %cst_58 = arith.constant 0.000000e+00 : f32
    %101 = vector.broadcast %cst_58 : f32 to vector<4x256xf32>
    %102 = arith.maximumf %100, %101 : vector<4x256xf32>
    %c0_59 = arith.constant 0 : index
    %c17_60 = arith.constant 17 : index
    %103 = vector.load %arg7[%c0_59, %c17_60] : memref<4x290xf32, #tpu.memory_space<vmem>>, vector<4x256xf32>
    tpu.vector_store %arg7[%c0_59, %c17_60], %102 {strides = array<i32>} : memref<4x290xf32, #tpu.memory_space<vmem>>, vector<4x256xf32>,
    %104 = vector.extract_strided_slice %102 {offsets = [0, 16], sizes = [4, 16], strides = [1, 1]} : vector<4x256xf32> to vector<4x16xf32>
    %c0_61 = arith.constant 0 : index
    %c1_62 = arith.constant 1 : index
    %105 = vector.load %arg7[%c0_61, %c1_62] : memref<4x290xf32, #tpu.memory_space<vmem>>, vector<4x16xf32>
    tpu.vector_store %arg7[%c0_61, %c1_62], %104 {strides = array<i32>} : memref<4x290xf32, #tpu.memory_space<vmem>>, vector<4x16xf32>,
    %106 = vector.extract_strided_slice %102 {offsets = [0, 224], sizes = [4, 16], strides = [1, 1]} : vector<4x256xf32> to vector<4x16xf32>
    %c0_63 = arith.constant 0 : index
    %c273_64 = arith.constant 273 : index
    %107 = vector.load %arg7[%c0_63, %c273_64] : memref<4x290xf32, #tpu.memory_space<vmem>>, vector<4x16xf32>
    tpu.vector_store %arg7[%c0_63, %c273_64], %106 {strides = array<i32>} : memref<4x290xf32, #tpu.memory_space<vmem>>, vector<4x16xf32>,
    %cst_65 = arith.constant 0.000000e+00 : f32
    %108 = vector.broadcast %cst_65 : f32 to vector<4x256xf32>
    %c0_66 = arith.constant 0 : index
    %c0_67 = arith.constant 0 : index
    %109 = vector.load %arg7[%c0_66, %c0_67] : memref<4x290xf32, #tpu.memory_space<vmem>>, vector<4x256xf32>
    %c0_68 = arith.constant 0 : index
    %c1_69 = arith.constant 1 : index
    %110 = vector.load %arg7[%c0_68, %c1_69] : memref<4x290xf32, #tpu.memory_space<vmem>>, vector<4x256xf32>
    %c0_70 = arith.constant 0 : index
    %c2_71 = arith.constant 2 : index
    %111 = vector.load %arg7[%c0_70, %c2_71] : memref<4x290xf32, #tpu.memory_space<vmem>>, vector<4x256xf32>
    %112 = arith.select %18, %111, %109 : vector<4x256xi1>, vector<4x256xf32>
    %113 = arith.select %20, %109, %111 : vector<4x256xi1>, vector<4x256xf32>
    %c0_72 = arith.constant 0 : index
    %c0_73 = arith.constant 0 : index
    %c0_74 = arith.constant 0 : index
    %114 = vector.load %arg3[%c0_72, %c0_73, %c0_74] : memref<9x4x4xf32, #tpu.memory_space<vmem>>, vector<1x4x4xf32>
    %115 = vector.shape_cast %114 : vector<1x4x4xf32> to vector<4x4xf32>
    %cst_75 = arith.constant dense<0.000000e+00> : vector<4x256xf32>
    %116 = tpu.matmul %115, %112, %cst_75 {dimension_numbers = #tpu.dot_dimension_numbers<[1], [0], [0], [1], [0, 0, 1, 1], [], []>} : vector<4x4xf32>, vector<4x256xf32>, vector<4x256xf32> -> vector<4x256xf32>
    %117 = arith.addf %108, %116 : vector<4x256xf32>
    %c1_76 = arith.constant 1 : index
    %c0_77 = arith.constant 0 : index
    %c0_78 = arith.constant 0 : index
    %118 = vector.load %arg3[%c1_76, %c0_77, %c0_78] : memref<9x4x4xf32, #tpu.memory_space<vmem>>, vector<1x4x4xf32>
    %119 = vector.shape_cast %118 : vector<1x4x4xf32> to vector<4x4xf32>
    %cst_79 = arith.constant dense<0.000000e+00> : vector<4x256xf32>
    %120 = tpu.matmul %119, %110, %cst_79 {dimension_numbers = #tpu.dot_dimension_numbers<[1], [0], [0], [1], [0, 0, 1, 1], [], []>} : vector<4x4xf32>, vector<4x256xf32>, vector<4x256xf32> -> vector<4x256xf32>
    %121 = arith.addf %117, %120 : vector<4x256xf32>
    %c2_80 = arith.constant 2 : index
    %c0_81 = arith.constant 0 : index
    %c0_82 = arith.constant 0 : index
    %122 = vector.load %arg3[%c2_80, %c0_81, %c0_82] : memref<9x4x4xf32, #tpu.memory_space<vmem>>, vector<1x4x4xf32>
    %123 = vector.shape_cast %122 : vector<1x4x4xf32> to vector<4x4xf32>
    %cst_83 = arith.constant dense<0.000000e+00> : vector<4x256xf32>
    %124 = tpu.matmul %123, %113, %cst_83 {dimension_numbers = #tpu.dot_dimension_numbers<[1], [0], [0], [1], [0, 0, 1, 1], [], []>} : vector<4x4xf32>, vector<4x256xf32>, vector<4x256xf32> -> vector<4x256xf32>
    %125 = arith.addf %121, %124 : vector<4x256xf32>
    %c0_84 = arith.constant 0 : index
    %c16_85 = arith.constant 16 : index
    %126 = vector.load %arg7[%c0_84, %c16_85] : memref<4x290xf32, #tpu.memory_space<vmem>>, vector<4x256xf32>
    %c0_86 = arith.constant 0 : index
    %c17_87 = arith.constant 17 : index
    %127 = vector.load %arg7[%c0_86, %c17_87] : memref<4x290xf32, #tpu.memory_space<vmem>>, vector<4x256xf32>
    %c0_88 = arith.constant 0 : index
    %c18_89 = arith.constant 18 : index
    %128 = vector.load %arg7[%c0_88, %c18_89] : memref<4x290xf32, #tpu.memory_space<vmem>>, vector<4x256xf32>
    %129 = arith.select %18, %128, %126 : vector<4x256xi1>, vector<4x256xf32>
    %130 = arith.select %20, %126, %128 : vector<4x256xi1>, vector<4x256xf32>
    %c3_90 = arith.constant 3 : index
    %c0_91 = arith.constant 0 : index
    %c0_92 = arith.constant 0 : index
    %131 = vector.load %arg3[%c3_90, %c0_91, %c0_92] : memref<9x4x4xf32, #tpu.memory_space<vmem>>, vector<1x4x4xf32>
    %132 = vector.shape_cast %131 : vector<1x4x4xf32> to vector<4x4xf32>
    %cst_93 = arith.constant dense<0.000000e+00> : vector<4x256xf32>
    %133 = tpu.matmul %132, %129, %cst_93 {dimension_numbers = #tpu.dot_dimension_numbers<[1], [0], [0], [1], [0, 0, 1, 1], [], []>} : vector<4x4xf32>, vector<4x256xf32>, vector<4x256xf32> -> vector<4x256xf32>
    %134 = arith.addf %125, %133 : vector<4x256xf32>
    %c4_94 = arith.constant 4 : index
    %c0_95 = arith.constant 0 : index
    %c0_96 = arith.constant 0 : index
    %135 = vector.load %arg3[%c4_94, %c0_95, %c0_96] : memref<9x4x4xf32, #tpu.memory_space<vmem>>, vector<1x4x4xf32>
    %136 = vector.shape_cast %135 : vector<1x4x4xf32> to vector<4x4xf32>
    %cst_97 = arith.constant dense<0.000000e+00> : vector<4x256xf32>
    %137 = tpu.matmul %136, %127, %cst_97 {dimension_numbers = #tpu.dot_dimension_numbers<[1], [0], [0], [1], [0, 0, 1, 1], [], []>} : vector<4x4xf32>, vector<4x256xf32>, vector<4x256xf32> -> vector<4x256xf32>
    %138 = arith.addf %134, %137 : vector<4x256xf32>
    %c5_98 = arith.constant 5 : index
    %c0_99 = arith.constant 0 : index
    %c0_100 = arith.constant 0 : index
    %139 = vector.load %arg3[%c5_98, %c0_99, %c0_100] : memref<9x4x4xf32, #tpu.memory_space<vmem>>, vector<1x4x4xf32>
    %140 = vector.shape_cast %139 : vector<1x4x4xf32> to vector<4x4xf32>
    %cst_101 = arith.constant dense<0.000000e+00> : vector<4x256xf32>
    %141 = tpu.matmul %140, %130, %cst_101 {dimension_numbers = #tpu.dot_dimension_numbers<[1], [0], [0], [1], [0, 0, 1, 1], [], []>} : vector<4x4xf32>, vector<4x256xf32>, vector<4x256xf32> -> vector<4x256xf32>
    %142 = arith.addf %138, %141 : vector<4x256xf32>
    %c0_102 = arith.constant 0 : index
    %c32_103 = arith.constant 32 : index
    %143 = vector.load %arg7[%c0_102, %c32_103] : memref<4x290xf32, #tpu.memory_space<vmem>>, vector<4x256xf32>
    %c0_104 = arith.constant 0 : index
    %c33_105 = arith.constant 33 : index
    %144 = vector.load %arg7[%c0_104, %c33_105] : memref<4x290xf32, #tpu.memory_space<vmem>>, vector<4x256xf32>
    %c0_106 = arith.constant 0 : index
    %c34_107 = arith.constant 34 : index
    %145 = vector.load %arg7[%c0_106, %c34_107] : memref<4x290xf32, #tpu.memory_space<vmem>>, vector<4x256xf32>
    %146 = arith.select %18, %145, %143 : vector<4x256xi1>, vector<4x256xf32>
    %147 = arith.select %20, %143, %145 : vector<4x256xi1>, vector<4x256xf32>
    %c6_108 = arith.constant 6 : index
    %c0_109 = arith.constant 0 : index
    %c0_110 = arith.constant 0 : index
    %148 = vector.load %arg3[%c6_108, %c0_109, %c0_110] : memref<9x4x4xf32, #tpu.memory_space<vmem>>, vector<1x4x4xf32>
    %149 = vector.shape_cast %148 : vector<1x4x4xf32> to vector<4x4xf32>
    %cst_111 = arith.constant dense<0.000000e+00> : vector<4x256xf32>
    %150 = tpu.matmul %149, %146, %cst_111 {dimension_numbers = #tpu.dot_dimension_numbers<[1], [0], [0], [1], [0, 0, 1, 1], [], []>} : vector<4x4xf32>, vector<4x256xf32>, vector<4x256xf32> -> vector<4x256xf32>
    %151 = arith.addf %142, %150 : vector<4x256xf32>
    %c7_112 = arith.constant 7 : index
    %c0_113 = arith.constant 0 : index
    %c0_114 = arith.constant 0 : index
    %152 = vector.load %arg3[%c7_112, %c0_113, %c0_114] : memref<9x4x4xf32, #tpu.memory_space<vmem>>, vector<1x4x4xf32>
    %153 = vector.shape_cast %152 : vector<1x4x4xf32> to vector<4x4xf32>
    %cst_115 = arith.constant dense<0.000000e+00> : vector<4x256xf32>
    %154 = tpu.matmul %153, %144, %cst_115 {dimension_numbers = #tpu.dot_dimension_numbers<[1], [0], [0], [1], [0, 0, 1, 1], [], []>} : vector<4x4xf32>, vector<4x256xf32>, vector<4x256xf32> -> vector<4x256xf32>
    %155 = arith.addf %151, %154 : vector<4x256xf32>
    %c8_116 = arith.constant 8 : index
    %c0_117 = arith.constant 0 : index
    %c0_118 = arith.constant 0 : index
    %156 = vector.load %arg3[%c8_116, %c0_117, %c0_118] : memref<9x4x4xf32, #tpu.memory_space<vmem>>, vector<1x4x4xf32>
    %157 = vector.shape_cast %156 : vector<1x4x4xf32> to vector<4x4xf32>
    %cst_119 = arith.constant dense<0.000000e+00> : vector<4x256xf32>
    %158 = tpu.matmul %157, %147, %cst_119 {dimension_numbers = #tpu.dot_dimension_numbers<[1], [0], [0], [1], [0, 0, 1, 1], [], []>} : vector<4x4xf32>, vector<4x256xf32>, vector<4x256xf32> -> vector<4x256xf32>
    %159 = arith.addf %155, %158 : vector<4x256xf32>
    %c0_120 = arith.constant 0 : index
    %c0_121 = arith.constant 0 : index
    %160 = vector.load %arg4[%c0_120, %c0_121] : memref<4x1xf32, #tpu.memory_space<vmem>>, vector<4x1xf32>
    %161 = vector.broadcast %160 : vector<4x1xf32> to vector<4x256xf32>
    %162 = arith.addf %159, %161 : vector<4x256xf32>
    %cst_122 = arith.constant dense<0.000000e+00> : vector<4xf32>
    %163 = vector.multi_reduction <add>, %162, %cst_122 [1] : vector<4x256xf32> to vector<4xf32>
    %164 = vector.shape_cast %163 : vector<4xf32> to vector<4x1xf32>
    %cst_123 = arith.constant 3.906250e-03 : f32
    %165 = vector.broadcast %cst_123 : f32 to vector<4x1xf32>
    %166 = arith.mulf %164, %165 : vector<4x1xf32>
    %167 = arith.mulf %162, %162 : vector<4x256xf32>
    %cst_124 = arith.constant dense<0.000000e+00> : vector<4xf32>
    %168 = vector.multi_reduction <add>, %167, %cst_124 [1] : vector<4x256xf32> to vector<4xf32>
    %169 = vector.shape_cast %168 : vector<4xf32> to vector<4x1xf32>
    %cst_125 = arith.constant 3.906250e-03 : f32
    %170 = vector.broadcast %cst_125 : f32 to vector<4x1xf32>
    %171 = arith.mulf %169, %170 : vector<4x1xf32>
    %172 = arith.mulf %166, %166 : vector<4x1xf32>
    %173 = arith.subf %171, %172 : vector<4x1xf32>
    %174 = vector.broadcast %166 : vector<4x1xf32> to vector<4x256xf32>
    %175 = arith.subf %162, %174 : vector<4x256xf32>
    %cst_126 = arith.constant 9.99999974E-6 : f32
    %176 = vector.broadcast %cst_126 : f32 to vector<4x1xf32>
    %177 = arith.addf %173, %176 : vector<4x1xf32>
    %178 = math.rsqrt %177 : vector<4x1xf32>
    %179 = vector.broadcast %178 : vector<4x1xf32> to vector<4x256xf32>
    %180 = arith.mulf %175, %179 : vector<4x256xf32>
    %181 = arith.addf %22, %180 : vector<4x256xf32>
    %cst_127 = arith.constant 0.000000e+00 : f32
    %182 = vector.broadcast %cst_127 : f32 to vector<4x256xf32>
    %183 = arith.maximumf %181, %182 : vector<4x256xf32>
    %c0_128 = arith.constant 0 : index
    %c0_129 = arith.constant 0 : index
    %c0_130 = arith.constant 0 : index
    %184 = vector.load %arg6[%c0_128, %c0_129, %c0_130] : memref<1x4x256xf32, #tpu.memory_space<vmem>>, vector<1x4x256xf32>
    %185 = vector.shape_cast %184 : vector<1x4x256xf32> to vector<4x256xf32>
    %186 = vector.shape_cast %183 : vector<4x256xf32> to vector<1x4x256xf32>
    tpu.vector_store %arg6[%c0_128, %c0_129, %c0_130], %186 {strides = array<i32>} : memref<1x4x256xf32, #tpu.memory_space<vmem>>, vector<1x4x256xf32>,
    return
  }
  func.func @transform_0(%arg0: i32) -> (i32, i32, i32) {
    %c0_i32 = arith.constant 0 : i32
    %c0_i32_0 = arith.constant 0 : i32
    %c0_i32_1 = arith.constant 0 : i32
    %c0_i32_2 = arith.constant 0 : i32
    return %c0_i32, %c0_i32_0, %c0_i32_1 : i32, i32, i32
  }
  func.func @transform_1(%arg0: i32) -> (i32, i32) {
    %c0_i32 = arith.constant 0 : i32
    %c0_i32_0 = arith.constant 0 : i32
    %c0_i32_1 = arith.constant 0 : i32
    return %c0_i32, %c0_i32_0 : i32, i32
  }
  func.func @transform_2(%arg0: i32) -> (i32, i32, i32) {
    %c0_i32 = arith.constant 0 : i32
    %c0_i32_0 = arith.constant 0 : i32
    %c0_i32_1 = arith.constant 0 : i32
    %c0_i32_2 = arith.constant 0 : i32
    return %c0_i32, %c0_i32_0, %c0_i32_1 : i32, i32, i32
  }
  func.func @transform_3(%arg0: i32) -> (i32, i32) {
    %c0_i32 = arith.constant 0 : i32
    %c0_i32_0 = arith.constant 0 : i32
    %c0_i32_1 = arith.constant 0 : i32
    return %c0_i32, %c0_i32_0 : i32, i32
  }
  func.func @transform_4(%arg0: i32) -> (i32, i32, i32) {
    %c0_i32 = arith.constant 0 : i32
    %c0_i32_0 = arith.constant 0 : i32
    %c0_i32_1 = arith.constant 0 : i32
    return %arg0, %c0_i32, %c0_i32_0 : i32, i32, i32
  }
  func.func @transform_5(%arg0: i32) -> (i32, i32, i32) {
    %c0_i32 = arith.constant 0 : i32
    %c0_i32_0 = arith.constant 0 : i32
    %c0_i32_1 = arith.constant 0 : i32
    return %arg0, %c0_i32, %c0_i32_0 : i32, i32, i32
  }
}

</mosaic_0001>

<bundles_post_ra>
// kernel: tpu_custom_call.1
= control target key start
LH: loop header
LB: loop body
LE: loop exit
PB: predicated region body
PF: predicated region fallthrough
CT: control target
= control target key end

     0   :  { %10 = vsyncpa [#allocation4], 0  ;;  %s2649_s0 = inlined_call_operand.vmem [shape: f32[9,4,4], index: 0, kind: input, shape index: {}]   ;;  %s2650_s1 = inlined_call_operand.vmem [shape: f32[4,1], index: 1, kind: input, shape index: {}]   ;;  %s2651_s2 = inlined_call_operand.vmem [shape: f32[9,4,4], index: 2, kind: input, shape index: {}]   ;;  %s2652_s3 = inlined_call_operand.vmem [shape: f32[4,1], index: 3, kind: input, shape index: {}]   ;;  %s2653_s4 = inlined_call_operand.vmem [shape: f32[2,4,256], index: 4, kind: input, shape index: {}]   ;;  %s2654_s5 = inlined_call_operand.hbm [shape: f32[2,4,256], index: 5, kind: output, shape index: {}]  }
   0x1   :  { %12 = vsyncpa [#allocation4 + $0x1], 0  ;;  %s2144_s18 = smov 0   ;;  %s2146_s19 = smov 0  }
   0x2   :  { %s2148_s20 = smov 0   ;;  %s2150_s21 = smov 0  }
   0x3 LB: > { %s2165_s22 = sadd.s32 4294967295, %s2100_s21   ;;  %s1878_s23 = sadd.s32 4294967294, %s2100_s21   ;;  %s2100_s21 = sphi %s2150_s21, %s2696_s21   ;;  %s2096_s20 = sphi %s2148_s20, %s2695_s20   ;;  %s2092_s19 = sphi %s2146_s19, %s2694_s19   ;;  %s2088_s18 = sphi %s2144_s18, %s2693_s18  }
   0x4   : > { %s2169_s24 = sadd.s32 1, %s2100_s21   ;;  %s135_s25 = sadd.s32 1, %s2096_s20 }
   0x5   : > { %s132_s26 = ssub.s32 %s2100_s21, %s2169_s24  ;;  %p145_p0 = scmp.ne.s32.totalorder %s2096_s20, %s2092_s19 }
   0x6   : > { %p133_p1 = scmp.eq.s32.totalorder %s132_s26, 0  ;;  %p146_p2 = scmp.eq.s32.totalorder %s2165_s22, 1 }
   0x7   : > { %p151_p3 = scmp.ne.s32.totalorder %s2092_s19, %s2088_s18  ;;  %p152_p4 = scmp.eq.s32.totalorder %s1878_s23, 1 }
   0x8   : > { %s2180_s27 = scalar_select %p133_p1, %s2096_s20, %s135_s25  }
   0x9   : > { %p2182_p5 = por %p146_p2, %p145_p0  ;;  %p2186_p6 = por %p152_p4, %p151_p3 }
   0xa   : > { %p1881_p7 = scmp.ge.s32.totalorder %s2100_s21, 1  ;;  %p190_p8 = scmp.lt.s32.totalorder %s2100_s21, 3 }
   0xc   : > { %p191_p9 = pnand %p1881_p7, %p190_p8 }
   0xd   : > { %p218_p10 = scmp.lt.s32.totalorder (!%p191_p9), %s2165_s22, 1  ;;  %s2102_s10 = smov (!%p191_p9), 17  }
   0xe   : > { %194 = sbr.rel (%p191_p9) target bundleno = 1357 (0x54d), region = 40  ;;  %s2103_s11 = smov (!%p191_p9), 49  }
   0xf   : > { %s2104_s12 = smov (!%p191_p9), 113   ;;  %s2105_s13 = smov (!%p191_p9), 126  }
  0x10   : > { %s2106_s14 = smov (!%p191_p9), 127   ;;  %s2107_s15 = smov (!%p191_p9), 110  }
  0x11   : > { %s2108_s16 = smov (!%p191_p9), 112   ;;  %s2109_s17 = smov (!%p191_p9), 111  }
  0x12   : > { %s2110_s23 = smov (!%p191_p9), 94   ;;  %s2111_s25 = smov (!%p191_p9), 96  }
  0x13   : > { %s219_s30 = scalar_select %p218_p10, %s2165_s22, 1  ;;  %vm263_vm0 = vcmask 1043592   ;;  %vm264_vm1 = vcmask 1047556   ;;  %vm259_vm2 = vcmask 138240   ;;  %vm267_vm3 = vcmask 134144  }
  0x14   : > { %vm2203_vm4 = vmor %vm264_vm1, %vm263_vm0  ;;  %vm278_vm5 = vcmask 265352   ;;  %vm272_vm6 = vcmask 134152   ;;  %v223_v43 = vlaneseq  ;;  %s2112_s26 = smov 95   ;;  %vm296_vm7 = vcmask 1031168  }
  0x15   : > { %s1978_s6 = sshll.u32 %s219_s30, 3  ;;  %vm353_vm9 = vcmask 1043456   ;;  %vm346_vm11 = vcmask 1039360   ;;  %vm349_vm14 = vcmask 31744   ;;  %vm2656_vm15 = vcmask 900096  }
  0x16   : > { %s2197_s9 = scalar_lea.vmem %s2653_s4, %s1978_s6  ;;  %v224_v46 = vand.u32 127, %v223_v43  ;;  %vm2655_vm0 = vcmask 916480   ;;  %vm2657_vm1 = vcmask 908288  }
  0x17   : > { %v254_v0 = vld [vmem:[%s2197_s9] sm:$0xff] }
  0x18   : > { %256 = vrot.lane.b32.xlu0 %v254_v0, %s2102_s10  ;;  %274 = vrot.lane.b32.xlu1 %v254_v0, %s2103_s11  ;;  %v225_v48 = vadd.s32 128, %v224_v46  ;;  %v230_v62 = vand.u32 15, %v224_v46  ;;  %v1909_v46 = vld [vmem:[%s2649_s0 + $0x14] sm:$0xf] }
  0x1a   : > { %v237_v52 = vand.u32 15, %v225_v48  ;;  %vm2284_vm10 = vcmp.eq.s32.totalorder %v230_v62, 0  ;;  %vm2297_vm12 = vcmp.eq.s32.totalorder %v230_v62, 15 }
  0x1c   : > { %vm2268_vm8 = vcmp.eq.s32.totalorder %v237_v52, 0  ;;  %vm2301_vm13 = vcmp.eq.s32.totalorder %v237_v52, 15  ;;  %v1904_v52 = vld [vmem:[%s2649_s0 + $0x10] sm:$0xf] }
  0x20   : > { %269 = vrot.lane.b32.xlu0 %v254_v0, %s2104_s12 }
  0x8a   : > { %v257_v1 = vpop.permute.xlu0 %256  ;;  %v275_v2 = vpop.permute.xlu1 %274 }
  0x8b   : > { %v258_v4 = vrot.slane %v257_v1, 4  ;;  %v276_v5 = vrot.slane %v275_v2, 4 }
  0x8d   : > { %v260_v6 = vsel %vm259_vm2, %v258_v4, %v257_v1  ;;  %268 = vst.msk [vmem:[#allocation2 + $0x8] sm:$0xf] %vm267_vm3, %v258_v4  ;;  %v1755_v1 = vld [vmem:[%s2652_s3] sm:$0xf] }
  0x8e   : > { %266 = vst.msk [vmem:[#allocation2] sm:$0xff] %vm2203_vm4, %v260_v6 }
  0x8f   : > { %279 = vst.msk [vmem:[#allocation2 + $0x8] sm:$0xf] %vm278_vm5, %v276_v5 }
  0x92   : > { %v270_v7 = vpop.permute.xlu0 %269 }
  0x93   : > { %273 = vst.msk [vmem:[#allocation2] sm:$0xf] %vm272_vm6, %v270_v7 }
  0x96   : > { %v281_v8 = vld [vmem:[#allocation2 + $0x8] sm:$0xf] }
  0x97   : > { %286 = vst [vmem:[#allocation1 + $0x10] ss:$2 sm:$0xff] %v281_v8  ;;  %v501_v16 = vld [vmem:[#allocation2 + $0x8] sm:$0xf] }
  0x98   : > { %v747_v33 = vld [vmem:[#allocation2 + $0x8] sm:$0xf] }
  0x9a   : > { %v2213_v9 = vld [vmem:[#allocation2] sm:$0xff] }
  0x9b   : > { %284 = vst [vmem:[#allocation1] ss:$2 sm:$0xff] %v2213_v9 }
  0x9e   : > { %v289_v10 = vld.sshfl [vmem:[#allocation1 + $0x10] sm:$0xff pattern:$0x75316420] }
  0x9f   : > { %315 = vst [vmem:[#allocation1 + $0x10] ss:$2 sm:$0xff] %v281_v8  ;;  %294 = vrot.lane.b32.xlu2 %v289_v10, %s2105_s13 }
  0xa2   : > { %v287_v11 = vld.sshfl [vmem:[#allocation1] sm:$0xff pattern:$0x75316420]  ;;  %v288_v12 = vld.sshfl [vmem:[#allocation1 + $0x8] sm:$0xff pattern:$0x75316420] }
  0xa3   : > { %301 = vst [vmem:[#allocation1] ss:$2 sm:$0xff] %v2213_v9  ;;  %290 = vrot.lane.b32.xlu1 %v287_v11, %s2105_s13 }
  0xa6   : > { %v318_v13 = vld.sshfl [vmem:[#allocation1 + $0x10] sm:$0xff pattern:$0x75316420] }
  0xa7   : > { %336 = vst [vmem:[#allocation1 + $0x10] ss:$2 sm:$0xff] %v281_v8  ;;  %292 = vrot.lane.b32.xlu2 %v288_v12, %s2105_s13 }
  0xaa   : > { %v2220_v14 = vld.sshfl [vmem:[#allocation1] sm:$0xff pattern:$0x75316420]  ;;  %v2222_v15 = vld.sshfl [vmem:[#allocation1 + $0x8] sm:$0xff pattern:$0x75316420] }
  0xab   : > { %308 = vst [vmem:[#allocation1] ss:$2 sm:$0xff] %v2213_v9 }
  0xae   : > { %v339_v17 = vld.sshfl [vmem:[#allocation1 + $0x10] sm:$0xff pattern:$0x75316420] }
  0xaf   : > { %506 = vst [vmem:[#allocation1 + $0x10] ss:$2 sm:$0xff] %v501_v16  ;;  %323 = vrot.lane.b32.xlu2 %v318_v13, %s2105_s13  ;;  %v1963_v13 = vld [vmem:[%s2651_s2 + $0x1c] sm:$0xf] }
  0xb2   : > { %v2226_v18 = vld.sshfl [vmem:[#allocation1] sm:$0xff pattern:$0x75316420]  ;;  %v2228_v19 = vld.sshfl [vmem:[#allocation1 + $0x8] sm:$0xff pattern:$0x75316420] }
  0xb3   : > { %313 = vst [vmem:[#allocation1] ss:$2 sm:$0xff] %v2213_v9 }
  0xb6   : > { %v509_v20 = vld.sshfl [vmem:[#allocation1 + $0x10] sm:$0xff pattern:$0x75316420] }
  0xb7   : > { %523 = vst [vmem:[#allocation1 + $0x10] ss:$2 sm:$0xff] %v501_v16  ;;  %344 = vrot.lane.b32.xlu2 %v339_v17, %s2106_s14 }
  0xba   : > { %v316_v21 = vld.sshfl [vmem:[#allocation1] sm:$0xff pattern:$0x75316420]  ;;  %v317_v22 = vld.sshfl [vmem:[#allocation1 + $0x8] sm:$0xff pattern:$0x75316420] }
  0xbb   : > { %334 = vst [vmem:[#allocation1] ss:$2 sm:$0xff] %v2213_v9  ;;  %321 = vrot.lane.b32.xlu1 %v317_v22, %s2105_s13  ;;  %319 = vrot.lane.b32.xlu0 %v316_v21, %s2105_s13 }
  0xbe   : > { %v526_v23 = vld.sshfl [vmem:[#allocation1 + $0x10] sm:$0xff pattern:$0x75316420] }
  0xbf   : > { %542 = vst [vmem:[#allocation1 + $0x10] ss:$2 sm:$0xff] %v501_v16  ;;  %514 = vrot.lane.b32.xlu2 %v509_v20, %s2107_s15 }
  0xc2   : > { %v337_v24 = vld.sshfl [vmem:[#allocation1] sm:$0xff pattern:$0x75316420]  ;;  %v338_v25 = vld.sshfl [vmem:[#allocation1 + $0x8] sm:$0xff pattern:$0x75316420] }
  0xc3   : > { %504 = vst [vmem:[#allocation1] ss:$2 sm:$0xff] %v2213_v9  ;;  %342 = vrot.lane.b32.xlu1 %v338_v25, %s2106_s14  ;;  %340 = vrot.lane.b32.xlu0 %v337_v24, %s2106_s14 }
  0xc6   : > { %v545_v26 = vld.sshfl [vmem:[#allocation1 + $0x10] sm:$0xff pattern:$0x75316420] }
  0xc7   : > { %558 = vst [vmem:[#allocation1 + $0x10] ss:$2 sm:$0xff] %v501_v16  ;;  %531 = vrot.lane.b32.xlu2 %v526_v23, %s2108_s16  ;;  %v331_v23 = vld [vmem:[%s2649_s0] sm:$0xf] }
  0xca   : > { %v507_v27 = vld.sshfl [vmem:[#allocation1] sm:$0xff pattern:$0x75316420]  ;;  %v508_v28 = vld.sshfl [vmem:[#allocation1 + $0x8] sm:$0xff pattern:$0x75316420] }
  0xcb   : > { %521 = vst [vmem:[#allocation1] ss:$2 sm:$0xff] %v2213_v9  ;;  %512 = vrot.lane.b32.xlu1 %v508_v28, %s2107_s15  ;;  %510 = vrot.lane.b32.xlu0 %v507_v27, %s2107_s15 }
  0xce   : > { %v561_v29 = vld.sshfl [vmem:[#allocation1 + $0x10] sm:$0xff pattern:$0x75316420] }
  0xcf   : > { %631 = vst [vmem:[#allocation1 + $0x10] ss:$2 sm:$0xff] %v501_v16  ;;  %550 = vrot.lane.b32.xlu2 %v545_v26, %s2108_s16 }
  0xd2   : > { %v524_v30 = vld.sshfl [vmem:[#allocation1] sm:$0xff pattern:$0x75316420]  ;;  %v525_v31 = vld.sshfl [vmem:[#allocation1 + $0x8] sm:$0xff pattern:$0x75316420] }
  0xd3   : > { %540 = vst [vmem:[#allocation1] ss:$2 sm:$0xff] %v2213_v9  ;;  %529 = vrot.lane.b32.xlu1 %v525_v31, %s2108_s16  ;;  %527 = vrot.lane.b32.xlu0 %v524_v30, %s2108_s16 }
  0xd6   : > { %v634_v32 = vld.sshfl [vmem:[#allocation1 + $0x10] sm:$0xff pattern:$0x75316420] }
  0xd7   : > { %752 = vst [vmem:[#allocation1 + $0x10] ss:$2 sm:$0xff] %v747_v33  ;;  %566 = vrot.lane.b32.xlu2 %v561_v29, %s2107_s15 }
  0xda   : > { %v543_v34 = vld.sshfl [vmem:[#allocation1] sm:$0xff pattern:$0x75316420]  ;;  %v544_v35 = vld.sshfl [vmem:[#allocation1 + $0x8] sm:$0xff pattern:$0x75316420] }
  0xdb   : > { %556 = vst [vmem:[#allocation1] ss:$2 sm:$0xff] %v2213_v9  ;;  %548 = vrot.lane.b32.xlu1 %v544_v35, %s2108_s16  ;;  %546 = vrot.lane.b32.xlu0 %v543_v34, %s2108_s16  ;;  %v1899_v34 = vld [vmem:[%s2649_s0 + $0xc] sm:$0xf] }
  0xde   : > { %v755_v36 = vld.sshfl [vmem:[#allocation1 + $0x10] sm:$0xff pattern:$0x75316420] }
  0xdf   : > { %769 = vst [vmem:[#allocation1 + $0x10] ss:$2 sm:$0xff] %v747_v33  ;;  %639 = vrot.lane.b32.xlu2 %v634_v32, %s2109_s17 }
  0xe2   : > { %v560_v37 = vld.sshfl [vmem:[#allocation1 + $0x8] sm:$0xff pattern:$0x75316420]  ;;  %v559_v38 = vld.sshfl [vmem:[#allocation1] sm:$0xff pattern:$0x75316420] }
  0xe3   : > { %564 = vrot.lane.b32.xlu1 %v560_v37, %s2107_s15  ;;  %562 = vrot.lane.b32.xlu0 %v559_v38, %s2107_s15  ;;  %629 = vst [vmem:[#allocation1] ss:$2 sm:$0xff] %v2213_v9 }
  0xe6   : > { %v772_v39 = vld.sshfl [vmem:[#allocation1 + $0x10] sm:$0xff pattern:$0x75316420] }
  0xe7   : > { %760 = vrot.lane.b32.xlu2 %v755_v36, %s2110_s23  ;;  %788 = vst [vmem:[#allocation1 + $0x10] ss:$2 sm:$0xff] %v747_v33 }
  0xea   : > { %v633_v40 = vld.sshfl [vmem:[#allocation1 + $0x8] sm:$0xff pattern:$0x75316420]  ;;  %v632_v41 = vld.sshfl [vmem:[#allocation1] sm:$0xff pattern:$0x75316420] }
  0xeb   : > { %637 = vrot.lane.b32.xlu1 %v633_v40, %s2109_s17  ;;  %635 = vrot.lane.b32.xlu0 %v632_v41, %s2109_s17  ;;  %750 = vst [vmem:[#allocation1] ss:$2 sm:$0xff] %v2213_v9 }
  0xee   : > { %v791_v42 = vld.sshfl [vmem:[#allocation1 + $0x10] sm:$0xff pattern:$0x75316420] }
  0xef   : > { %777 = vrot.lane.b32.xlu2 %v772_v39, %s2111_s25  ;;  %804 = vst [vmem:[#allocation1 + $0x10] ss:$2 sm:$0xff] %v747_v33 }
  0xf2   : > { %v754_v44 = vld.sshfl [vmem:[#allocation1 + $0x8] sm:$0xff pattern:$0x75316420]  ;;  %v753_v45 = vld.sshfl [vmem:[#allocation1] sm:$0xff pattern:$0x75316420] }
  0xf3   : > { %758 = vrot.lane.b32.xlu1 %v754_v44, %s2110_s23  ;;  %756 = vrot.lane.b32.xlu0 %v753_v45, %s2110_s23  ;;  %767 = vst [vmem:[#allocation1] ss:$2 sm:$0xff] %v2213_v9 }
  0xf6   : > { %v807_v47 = vld.sshfl [vmem:[#allocation1 + $0x10] sm:$0xff pattern:$0x75316420] }
  0xf7   : > { %796 = vrot.lane.b32.xlu2 %v791_v42, %s2111_s25  ;;  %877 = vst [vmem:[#allocation1 + $0x10] ss:$2 sm:$0xff] %v747_v33  ;;  %v1894_v33 = vld [vmem:[%s2649_s0 + $0x8] sm:$0xf] }
  0xf9   : > { %v295_v49 = vpop.permute.xlu2 %294 }
  0xfa   : > { %v771_v50 = vld.sshfl [vmem:[#allocation1 + $0x8] sm:$0xff pattern:$0x75316420]  ;;  %v770_v51 = vld.sshfl [vmem:[#allocation1] sm:$0xff pattern:$0x75316420] }
  0xfb   : > { %775 = vrot.lane.b32.xlu1 %v771_v50, %s2111_s25  ;;  %773 = vrot.lane.b32.xlu0 %v770_v51, %s2111_s25  ;;  %786 = vst [vmem:[#allocation1] ss:$2 sm:$0xff] %v2213_v9 }
  0xfe   : > { %v880_v53 = vld.sshfl [vmem:[#allocation1 + $0x10] sm:$0xff pattern:$0x75316420] }
  0xff   : > { %885 = vrot.lane.b32.xlu2 %v880_v53, %s2112_s26 }
 0x101   : > { %v293_v55 = vpop.permute.xlu2 %292 }
 0x102   : > { %v298_v56 = vsel %vm296_vm7, %v293_v55, %v295_v49  ;;  %v790_v57 = vld.sshfl [vmem:[#allocation1 + $0x8] sm:$0xff pattern:$0x75316420]  ;;  %v789_v58 = vld.sshfl [vmem:[#allocation1] sm:$0xff pattern:$0x75316420] }
 0x103   : > { %v307_v59 = vsel %vm2268_vm8, %v298_v56, %v2222_v15  ;;  %794 = vrot.lane.b32.xlu1 %v790_v57, %s2111_s25  ;;  %802 = vst [vmem:[#allocation1] ss:$2 sm:$0xff] %v2213_v9  ;;  %792 = vrot.lane.b32.xlu0 %v789_v58, %s2111_s25 }
 0x104   : > { %1892 = vmatpush.msk.msra.mxu3 %vm353_vm9, %v307_v59 }
 0x105   : > { %1893 = vmatmul.msk.f32.vlgmr.msra.gmra.mxu3 %vm349_vm14, %v331_v23 }
 0x107   : > { %812 = vrot.lane.b32.xlu2 %v807_v47, %s2110_s23 }
 0x109   : > { %v324_v6 = vpop.permute.xlu2 %323 }
 0x10a   : > { %v805_v60 = vld.sshfl [vmem:[#allocation1] sm:$0xff pattern:$0x75316420]  ;;  %v806_v61 = vld.sshfl [vmem:[#allocation1 + $0x8] sm:$0xff pattern:$0x75316420] }
 0x10b   : > { %875 = vst [vmem:[#allocation1] ss:$2 sm:$0xff] %v2213_v9 }
 0x111   : > { %v345_v7 = vpop.permute.xlu2 %344 }
 0x112   : > { %v879_v63 = vld.sshfl [vmem:[#allocation1 + $0x8] sm:$0xff pattern:$0x75316420]  ;;  %v878_v0 = vld.sshfl [vmem:[#allocation1] sm:$0xff pattern:$0x75316420] }
 0x113   : > { %883 = vrot.lane.b32.xlu1 %v879_v63, %s2112_s26  ;;  %881 = vrot.lane.b32.xlu0 %v878_v0, %s2112_s26 }
 0x115   : > { %v291_v2 = vpop.permute.xlu1 %290 }
 0x116   : > { %v297_v4 = vsel %vm296_vm7, %v291_v2, %v293_v55 }
 0x117   : > { %v306_v5 = vsel %vm2284_vm10, %v297_v4, %v2220_v14  ;;  %v1914_v4 = vld [vmem:[%s2649_s0 + $0x18] sm:$0xf] }
 0x118   : > { %1890 = vmatpush.msk.msra.mxu2 %vm353_vm9, %v306_v5 }
 0x119   : > { %v515_v10 = vpop.permute.xlu2 %514  ;;  %1891 = vmatmul.msk.f32.vlgmr.msra.gmra.mxu2 %vm349_vm14, %v331_v23 }
 0x11b   : > { %810 = vrot.lane.b32.xlu1 %v806_v61, %s2110_s23  ;;  %808 = vrot.lane.b32.xlu0 %v805_v60, %s2110_s23 }
 0x121   : > { %v532_v24 = vpop.permute.xlu2 %531 }
 0x129   : > { %v551_v26 = vpop.permute.xlu2 %550 }
 0x12d   : > { %v322_v8 = vpop.permute.xlu1 %321  ;;  %v320_v9 = vpop.permute.xlu0 %319 }
 0x12e   : > { %v326_v11 = vsel %vm296_vm7, %v322_v8, %v324_v6  ;;  %v325_v12 = vsel %vm296_vm7, %v320_v9, %v322_v8  ;;  %v2113_v8 = vmov 0  }
 0x12f   : > { %v329_v21 = vsel %vm2297_vm12, %v2226_v18, %v325_v12  ;;  %v330_v22 = vsel %vm2301_vm13, %v2228_v19, %v326_v11  ;;  %v1885_v19 = vld [vmem:[%s2649_s0 + $0x4] sm:$0xf]  ;;  %2031 = vset.pattern.permute.xlu0 %v2113_v8  ;;  %2032 = vset.pattern.permute.xlu2 %v2113_v8 }
 0x131   : > { %v567_v39 = vpop.permute.xlu2 %566 }
 0x135   : > { %v343_v15 = vpop.permute.xlu1 %342  ;;  %v341_v16 = vpop.permute.xlu0 %340 }
 0x136   : > { %v347_v17 = vsel %vm346_vm11, %v341_v16, %v343_v15  ;;  %v348_v20 = vsel %vm346_vm11, %v343_v15, %v345_v7  ;;  %v992_v7 = vld [vmem:[%s2650_s1] sm:$0xf] }
 0x137   : > { %1886 = vmatpush.msk.msra.mxu0 %vm353_vm9, %v347_v17  ;;  %1888 = vmatpush.msk.msra.mxu1 %vm353_vm9, %v348_v20  ;;  %v1919_v17 = vld [vmem:[%s2649_s0 + $0x1c] sm:$0xf] }
 0x138   : > { %1887 = vmatmul.msk.f32.vlgmr.msra.gmra.mxu0 %vm349_vm14, %v1885_v19  ;;  %1889 = vmatmul.msk.f32.vlgmr.msra.gmra.mxu1 %vm349_vm14, %v1885_v19 }
 0x139   : > { %1895 = vmatpush.msk.msrb.mxu0 %vm353_vm9, %v329_v21  ;;  %1897 = vmatpush.msk.msrb.mxu1 %vm353_vm9, %v330_v22  ;;  %v640_v49 = vpop.permute.xlu2 %639 }
 0x13a   : > { %995 = vperm.xlu0 %2031, %v992_v7  }
 0x13d   : > { %v513_v25 = vpop.permute.xlu1 %512  ;;  %v511_v18 = vpop.permute.xlu0 %510 }
 0x13e   : > { %v518_v29 = vsel %vm2656_vm15, %v513_v25, %v515_v10  ;;  %v517_v30 = vsel %vm2656_vm15, %v511_v18, %v513_v25 }
 0x140   : > { %1896 = vmatmul.msk.f32.vlgmr.msrb.gmra.mxu0 %vm349_vm14, %v1894_v33  ;;  %1898 = vmatmul.msk.f32.vlgmr.msrb.gmra.mxu1 %vm349_vm14, %v1894_v33 }
 0x141   : > { %v761_v56 = vpop.permute.xlu2 %760 }
 0x145   : > { %v530_v27 = vpop.permute.xlu1 %529  ;;  %v528_v28 = vpop.permute.xlu0 %527 }
 0x146   : > { %v535_v31 = vsel %vm2655_vm0, %v530_v27, %v532_v24  ;;  %v534_v32 = vsel %vm2655_vm0, %v528_v28, %v530_v27  ;;  %v1924_v27 = vld [vmem:[%s2649_s0 + $0x20] sm:$0xf] }
 0x147   : > { %v538_v35 = vsel %vm2284_vm10, %v517_v30, %v534_v32  ;;  %v539_v36 = vsel %vm2268_vm8, %v518_v29, %v535_v31 }
 0x148   : > { %1900 = vmatpush.msk.msrb.mxu2 %vm353_vm9, %v538_v35  ;;  %1902 = vmatpush.msk.msrb.mxu3 %vm353_vm9, %v539_v36 }
 0x149   : > { %1901 = vmatmul.msk.f32.vlgmr.msrb.gmra.mxu2 %vm349_vm14, %v1899_v34  ;;  %1903 = vmatmul.msk.f32.vlgmr.msrb.gmra.mxu3 %vm349_vm14, %v1899_v34  ;;  %v778_v59 = vpop.permute.xlu2 %777 }
 0x14d   : > { %v549_v37 = vpop.permute.xlu1 %548  ;;  %v547_v38 = vpop.permute.xlu0 %546 }
 0x14e   : > { %v553_v42 = vsel %vm2655_vm0, %v549_v37, %v551_v26  ;;  %v552_v43 = vsel %vm2655_vm0, %v547_v38, %v549_v37  ;;  %vm2660_vm0 = vcmask 769024  }
 0x151   : > { %v797_v9 = vpop.permute.xlu2 %796 }
 0x155   : > { %v565_v40 = vpop.permute.xlu1 %564  ;;  %v563_v41 = vpop.permute.xlu0 %562 }
 0x156   : > { %v569_v44 = vsel %vm2656_vm15, %v565_v40, %v567_v39  ;;  %v568_v45 = vsel %vm2656_vm15, %v563_v41, %v565_v40  ;;  %vm2659_vm15 = vcmask 785408  }
 0x157   : > { %v573_v47 = vsel %vm2301_vm13, %v553_v42, %v569_v44  ;;  %v572_v48 = vsel %vm2297_vm12, %v552_v43, %v568_v45 }
 0x158   : > { %1910 = vmatpush.msk.msra.mxu2 %vm353_vm9, %v572_v48  ;;  %1912 = vmatpush.msk.msra.mxu3 %vm353_vm9, %v573_v47 }
 0x159   : > { %1911 = vmatmul.msk.f32.vlgmr.msra.gmra.mxu2 %vm349_vm14, %v1909_v46  ;;  %1913 = vmatmul.msk.f32.vlgmr.msra.gmra.mxu3 %vm349_vm14, %v1909_v46  ;;  %v886_v12 = vpop.permute.xlu2 %885 }
 0x15d   : > { %v638_v50 = vpop.permute.xlu1 %637  ;;  %v636_v51 = vpop.permute.xlu0 %635 }
 0x15e   : > { %v643_v53 = vsel %vm2657_vm1, %v638_v50, %v640_v49  ;;  %v642_v55 = vsel %vm2657_vm1, %v636_v51, %v638_v50  ;;  %vm2658_vm1 = vcmask 777216  }
 0x15f   : > { %1905 = vmatpush.msk.msra.mxu0 %vm353_vm9, %v642_v55  ;;  %1907 = vmatpush.msk.msra.mxu1 %vm353_vm9, %v643_v53 }
 0x160   : > { %1906 = vmatmul.msk.f32.vlgmr.msra.gmra.mxu0 %vm349_vm14, %v1904_v52  ;;  %1908 = vmatmul.msk.f32.vlgmr.msra.gmra.mxu1 %vm349_vm14, %v1904_v52 }
 0x161   : > { %v813_v22 = vpop.permute.xlu2 %812 }
 0x165   : > { %v759_v57 = vpop.permute.xlu1 %758  ;;  %v757_v58 = vpop.permute.xlu0 %756 }
 0x166   : > { %v764_v62 = vsel %vm2660_vm0, %v759_v57, %v761_v56  ;;  %v763_v63 = vsel %vm2660_vm0, %v757_v58, %v759_v57 }
 0x16d   : > { %v776_v60 = vpop.permute.xlu1 %775  ;;  %v774_v61 = vpop.permute.xlu0 %773 }
 0x16e   : > { %v781_v0 = vsel %vm2659_vm15, %v776_v60, %v778_v59  ;;  %v780_v2 = vsel %vm2659_vm15, %v774_v61, %v776_v60 }
 0x16f   : > { %v785_v5 = vsel %vm2268_vm8, %v764_v62, %v781_v0  ;;  %v784_v6 = vsel %vm2284_vm10, %v763_v63, %v780_v2 }
 0x170   : > { %1915 = vmatpush.msk.msrb.mxu0 %vm353_vm9, %v784_v6  ;;  %1917 = vmatpush.msk.msrb.mxu1 %vm353_vm9, %v785_v5 }
 0x171   : > { %1916 = vmatmul.msk.f32.vlgmr.msrb.gmra.mxu0 %vm349_vm14, %v1914_v4  ;;  %1918 = vmatmul.msk.f32.vlgmr.msrb.gmra.mxu1 %vm349_vm14, %v1914_v4 }
 0x175   : > { %v795_v10 = vpop.permute.xlu1 %794  ;;  %v793_v11 = vpop.permute.xlu0 %792 }
 0x176   : > { %v799_v25 = vsel %vm2659_vm15, %v795_v10, %v797_v9  ;;  %v798_v18 = vsel %vm2659_vm15, %v793_v11, %v795_v10 }
 0x185   : > { %v884_v15 = vpop.permute.xlu1 %883  ;;  %v882_v16 = vpop.permute.xlu0 %881 }
 0x186   : > { %v889_v20 = vsel %vm2658_vm1, %v884_v15, %v886_v12  ;;  %v888_v21 = vsel %vm2658_vm1, %v882_v16, %v884_v15 }
 0x187   : > { %1920 = vmatpush.msk.msrb.mxu2 %vm353_vm9, %v888_v21  ;;  %1922 = vmatpush.msk.msrb.mxu3 %vm353_vm9, %v889_v20 }
 0x188   : > { %1921 = vmatmul.msk.f32.vlgmr.msrb.gmra.mxu2 %vm349_vm14, %v1919_v17  ;;  %1923 = vmatmul.msk.f32.vlgmr.msrb.gmra.mxu3 %vm349_vm14, %v1919_v17  ;;  %v444_v33 = vpop.f32.mrf.mxu3 }
 0x18d   : > { %v811_v23 = vpop.permute.xlu1 %810  ;;  %v809_v24 = vpop.permute.xlu0 %808 }
 0x18e   : > { %v815_v19 = vsel %vm2660_vm0, %v811_v23, %v813_v22  ;;  %v814_v26 = vsel %vm2660_vm0, %v809_v24, %v811_v23 }
 0x18f   : > { %v819_v28 = vsel %vm2301_vm13, %v799_v25, %v815_v19  ;;  %v818_v29 = vsel %vm2297_vm12, %v798_v18, %v814_v26 }
 0x190   : > { %1925 = vmatpush.msk.msra.mxu0 %vm353_vm9, %v818_v29  ;;  %1927 = vmatpush.msk.msra.mxu1 %vm353_vm9, %v819_v28 }
 0x191   : > { %1926 = vmatmul.msk.f32.vlgmr.msra.gmra.mxu0 %vm349_vm14, %v1924_v27  ;;  %1928 = vmatmul.msk.f32.vlgmr.msra.gmra.mxu1 %vm349_vm14, %v1924_v27 }
 0x19c   : > { %v424_v32 = vpop.f32.mrf.mxu2 }
 0x1ac   : > { %v996_v61 = vpop.permute.xlu0 %995 }
 0x1b5   : > { %v375_v30 = vpop.f32.mrf.mxu0  ;;  %v395_v31 = vpop.f32.mrf.mxu1 }
 0x1b6   : > { %v425_v36 = vadd.f32 %v424_v32, %v375_v30  ;;  %v445_v37 = vadd.f32 %v444_v33, %v395_v31 }
 0x1bd   : > { %v475_v34 = vpop.f32.mrf.mxu0  ;;  %v495_v35 = vpop.f32.mrf.mxu1 }
 0x1be   : > { %v498_v40 = vadd.f32 %v475_v34, %v425_v36  ;;  %v499_v41 = vadd.f32 %v495_v35, %v445_v37 }
 0x1cc   : > { %v602_v38 = vpop.f32.mrf.mxu2  ;;  %v622_v39 = vpop.f32.mrf.mxu3 }
 0x1cd   : > { %v625_v44 = vadd.f32 %v602_v38, %v498_v40  ;;  %v626_v45 = vadd.f32 %v622_v39, %v499_v41 }
 0x1dc   : > { %v721_v48 = vpop.f32.mrf.mxu2  ;;  %v741_v49 = vpop.f32.mrf.mxu3 }
 0x1dd   : > { %v668_v42 = vpop.f32.mrf.mxu0  ;;  %v688_v43 = vpop.f32.mrf.mxu1 }
 0x1de   : > { %v691_v46 = vadd.f32 %v668_v42, %v625_v44  ;;  %v692_v47 = vadd.f32 %v688_v43, %v626_v45 }
 0x1e0   : > { %v744_v50 = vadd.f32 %v721_v48, %v691_v46  ;;  %v745_v51 = vadd.f32 %v741_v49, %v692_v47 }
 0x1ee   : > { %v848_v52 = vpop.f32.mrf.mxu0  ;;  %v868_v53 = vpop.f32.mrf.mxu1 }
 0x1ef   : > { %v871_v55 = vadd.f32 %v848_v52, %v744_v50  ;;  %v872_v56 = vadd.f32 %v868_v53, %v745_v51 }
 0x20b   : > { %v914_v57 = vpop.f32.mrf.mxu2  ;;  %v934_v58 = vpop.f32.mrf.mxu3 }
 0x20c   : > { %v937_v59 = vadd.f32 %v914_v57, %v871_v55  ;;  %v938_v60 = vadd.f32 %v934_v58, %v872_v56 }
 0x20e   : > { %v967_v62 = vpop.f32.mrf.mxu0  ;;  %v987_v63 = vpop.f32.mrf.mxu1 }
 0x20f   : > { %v990_v0 = vadd.f32 %v967_v62, %v937_v59  ;;  %v991_v2 = vadd.f32 %v987_v63, %v938_v60 }
 0x211   : > { %v998_v4 = vadd.f32 %v996_v61, %v990_v0  ;;  %v999_v5 = vadd.f32 %v996_v61, %v991_v2 }
 0x213   : > { %v1000_v6 = vsel %vm353_vm9, %v998_v4, 0.0  ;;  %v1001_v7 = vsel %vm353_vm9, %v999_v5, 0.0  ;;  %v1006_v8 = vmul.f32 %v998_v4, %v998_v4  ;;  %v1007_v9 = vmul.f32 %v999_v5, %v999_v5 }
 0x214   : > { %v1002_v10 = vadd.f32 %v1001_v7, %v1000_v6 }
 0x215   : > { %v1008_v11 = vsel %vm353_vm9, %v1006_v8, 0.0  ;;  %v1009_v12 = vsel %vm353_vm9, %v1007_v9, 0.0 }
 0x216   : > { %1003 = vadd.xlane.f32.xlu1 %v1002_v10  ;;  %v1010_v15 = vadd.f32 %v1009_v12, %v1008_v11 }
 0x218   : > { %1011 = vadd.xlane.f32.xlu2 %v1010_v15 }
 0x289   : > { %v1004_v16 = vpop.xlane.xlu1 %1003 }
 0x28a   : > { %v1005_v17 = vmul.f32 0.00390625, %v1004_v16 }
 0x28b   : > { %v1012_v20 = vpop.xlane.xlu2 %1011 }
 0x28c   : > { %v1013_v21 = vmul.f32 0.00390625, %v1012_v20  ;;  %v1014_v22 = vmul.f32 %v1005_v17, %v1005_v17  ;;  %v1016_v29 = vsub.f32 %v998_v4, %v1005_v17  ;;  %v1017_v30 = vsub.f32 %v999_v5, %v1005_v17 }
 0x28e   : > { %v1015_v23 = vsub.f32 %v1013_v21, %v1014_v22 }
 0x290   : > { %v1018_v24 = vadd.f32 1e-05, %v1015_v23 }
 0x292   : > { %2033 = vrsqrt.f32 %v1018_v24  ;;  %vm1025_vm15 = vweird.f32 %v1018_v24 }
 0x298   : > { %v2034_v25 = vpop.eup %2033 }
 0x299   : > { %v1020_v18 = vmul.f32 %v2034_v25, %v1018_v24  ;;  %vm1026_vm1 = vweird.f32 %v2034_v25 }
 0x29a   : > { %vm1027_vm0 = vmor %vm1025_vm15, %vm1026_vm1  ;;  %vm2682_vm1 = vcmask 769024  }
 0x29b   : > { %v1021_v19 = vmul.f32 %v2034_v25, %v1020_v18 }
 0x29d   : > { %v1022_v26 = vmul.f32 0.5, %v1021_v19 }
 0x29f   : > { %v1023_v27 = vsub.f32 1.5, %v1022_v26 }
 0x2a1   : > { %v1024_v28 = vmul.f32 %v2034_v25, %v1023_v27 }
 0x2a3   : > { %v1028_v31 = vsel %vm1027_vm0, %v2034_v25, %v1024_v28 }
 0x2a4   : > { %v1029_v32 = vmul.f32 %v1028_v31, %v1016_v29  ;;  %v1030_v33 = vmul.f32 %v1028_v31, %v1017_v30 }
 0x2a6   : > { %v1032_v34 = vmax.f32 %v1030_v33, 0.0  ;;  %v1031_v35 = vmax.f32 %v1029_v32, 0.0 }
 0x2a8   : > { %v1035_v36 = vrot.slane %v1032_v34, 4 }
 0x2aa   : > { %v1036_v37 = vsel %vm353_vm9, %v1031_v35, %v1035_v36 }
 0x2ab   : > { %1037 = vrot.lane.b32.xlu0 %v1036_v37, %s2102_s10 }
 0x2b3   : > { %1045 = vrot.lane.b32.xlu0 %v1031_v35, %s2104_s12 }
 0x2bb   : > { %1049 = vrot.lane.b32.xlu0 %v1032_v34, %s2103_s11 }
 0x31d   : > { %v1038_v38 = vpop.permute.xlu0 %1037 }
 0x31e   : > { %v1039_v39 = vrot.slane %v1038_v38, 4 }
 0x320   : > { %v1040_v40 = vsel %vm259_vm2, %v1039_v39, %v1038_v38  ;;  %1044 = vst.msk [vmem:[#allocation2 + $0x8] sm:$0xf] %vm267_vm3, %v1039_v39  ;;  %vm2673_vm2 = vcmask 900096   ;;  %vm2674_vm3 = vcmask 916480  }
 0x321   : > { %1043 = vst.msk [vmem:[#allocation2] sm:$0xff] %vm2203_vm4, %v1040_v40  ;;  %vm2675_vm4 = vmmov %vm2673_vm2 }
 0x322   : > { %vm2678_vm15 = vmmov %vm2673_vm2 }
 0x323   : > { %vm2681_vm0 = vmmov %vm2673_vm2 }
 0x325   : > { %v1046_v41 = vpop.permute.xlu0 %1045 }
 0x326   : > { %1048 = vst.msk [vmem:[#allocation2] sm:$0xf] %vm272_vm6, %v1046_v41  ;;  %vm2677_vm6 = vmmov %vm2674_vm3 }
 0x32d   : > { %v2426_v42 = vld [vmem:[#allocation2] sm:$0xff]  ;;  %v1050_v43 = vpop.permute.xlu0 %1049 }
 0x32e   : > { %1057 = vst [vmem:[#allocation1] ss:$2 sm:$0xff] %v2426_v42 }
 0x32f   : > { %1052 = vst.msk [vmem:[#allocation2 + $0x8] sm:$0xf] %vm278_vm5, %v1050_v43  ;;  %vm2676_vm5 = vmmov %vm2674_vm3 }
 0x335   : > { %v1060_v44 = vld.sshfl [vmem:[#allocation1] sm:$0xff pattern:$0x75316420]  ;;  %v1061_v45 = vld.sshfl [vmem:[#allocation1 + $0x8] sm:$0xff pattern:$0x75316420] }
 0x336   : > { %1073 = vst [vmem:[#allocation1] ss:$2 sm:$0xff] %v2426_v42  ;;  %v1054_v46 = vld [vmem:[#allocation2 + $0x8] sm:$0xf]  ;;  %1065 = vrot.lane.b32.xlu1 %v1061_v45, %s2105_s13  ;;  %1063 = vrot.lane.b32.xlu2 %v1060_v44, %s2105_s13  ;;  %v1103_v44 = vld [vmem:[%s2651_s2] sm:$0xf] }
 0x337   : > { %1059 = vst [vmem:[#allocation1 + $0x10] ss:$2 sm:$0xff] %v1054_v46  ;;  %v1270_v52 = vld [vmem:[#allocation2 + $0x8] sm:$0xf] }
 0x338   : > { %v1513_v7 = vld [vmem:[#allocation2 + $0x8] sm:$0xf] }
 0x33d   : > { %v2433_v3 = vld.sshfl [vmem:[#allocation1] sm:$0xff pattern:$0x75316420]  ;;  %v2435_v47 = vld.sshfl [vmem:[#allocation1 + $0x8] sm:$0xff pattern:$0x75316420] }
 0x33e   : > { %1080 = vst [vmem:[#allocation1] ss:$2 sm:$0xff] %v2426_v42  ;;  %v1062_v48 = vld.sshfl [vmem:[#allocation1 + $0x10] sm:$0xff pattern:$0x75316420] }
 0x33f   : > { %1067 = vrot.lane.b32.xlu0 %v1062_v48, %s2105_s13  ;;  %1087 = vst [vmem:[#allocation1 + $0x10] ss:$2 sm:$0xff] %v1054_v46 }
 0x345   : > { %v2439_v49 = vld.sshfl [vmem:[#allocation1] sm:$0xff pattern:$0x75316420]  ;;  %v2441_v50 = vld.sshfl [vmem:[#allocation1 + $0x8] sm:$0xff pattern:$0x75316420] }
 0x346   : > { %1085 = vst [vmem:[#allocation1] ss:$2 sm:$0xff] %v2426_v42  ;;  %v1090_v51 = vld.sshfl [vmem:[#allocation1 + $0x10] sm:$0xff pattern:$0x75316420] }
 0x347   : > { %1095 = vrot.lane.b32.xlu0 %v1090_v51, %s2105_s13  ;;  %1108 = vst [vmem:[#allocation1 + $0x10] ss:$2 sm:$0xff] %v1054_v46 }
 0x34d   : > { %v1088_v53 = vld.sshfl [vmem:[#allocation1] sm:$0xff pattern:$0x75316420]  ;;  %v1089_v55 = vld.sshfl [vmem:[#allocation1 + $0x8] sm:$0xff pattern:$0x75316420] }
 0x34e   : > { %1106 = vst [vmem:[#allocation1] ss:$2 sm:$0xff] %v2426_v42  ;;  %v1111_v56 = vld.sshfl [vmem:[#allocation1 + $0x10] sm:$0xff pattern:$0x75316420] }
 0x34f   : > { %1116 = vrot.lane.b32.xlu1 %v1111_v56, %s2106_s14  ;;  %1275 = vst [vmem:[#allocation1 + $0x10] ss:$2 sm:$0xff] %v1270_v52 }
 0x355   : > { %v1109_v57 = vld.sshfl [vmem:[#allocation1] sm:$0xff pattern:$0x75316420]  ;;  %v1110_v58 = vld.sshfl [vmem:[#allocation1 + $0x8] sm:$0xff pattern:$0x75316420] }
 0x356   : > { %1114 = vrot.lane.b32.xlu2 %v1110_v58, %s2106_s14  ;;  %1273 = vst [vmem:[#allocation1] ss:$2 sm:$0xff] %v2426_v42  ;;  %v1278_v59 = vld.sshfl [vmem:[#allocation1 + $0x10] sm:$0xff pattern:$0x75316420] }
 0x357   : > { %1283 = vrot.lane.b32.xlu0 %v1278_v59, %s2107_s15  ;;  %1291 = vst [vmem:[#allocation1 + $0x10] ss:$2 sm:$0xff] %v1270_v52 }
 0x35d   : > { %v1276_v60 = vld.sshfl [vmem:[#allocation1] sm:$0xff pattern:$0x75316420]  ;;  %v1277_v61 = vld.sshfl [vmem:[#allocation1 + $0x8] sm:$0xff pattern:$0x75316420] }
 0x35e   : > { %1279 = vrot.lane.b32.xlu2 %v1276_v60, %s2107_s15  ;;  %1281 = vrot.lane.b32.xlu1 %v1277_v61, %s2107_s15  ;;  %1289 = vst [vmem:[#allocation1] ss:$2 sm:$0xff] %v2426_v42  ;;  %v1294_v62 = vld.sshfl [vmem:[#allocation1 + $0x10] sm:$0xff pattern:$0x75316420] }
 0x35f   : > { %1091 = vrot.lane.b32.xlu0 %v1088_v53, %s2105_s13  ;;  %1309 = vst [vmem:[#allocation1 + $0x10] ss:$2 sm:$0xff] %v1270_v52  ;;  %v1938_v60 = vld [vmem:[%s2651_s2 + $0x8] sm:$0xf] }
 0x365   : > { %v1292_v63 = vld.sshfl [vmem:[#allocation1] sm:$0xff pattern:$0x75316420]  ;;  %v1293_v0 = vld.sshfl [vmem:[#allocation1 + $0x8] sm:$0xff pattern:$0x75316420] }
 0x366   : > { %1295 = vrot.lane.b32.xlu2 %v1292_v63, %s2108_s16  ;;  %1297 = vrot.lane.b32.xlu1 %v1293_v0, %s2108_s16  ;;  %1307 = vst [vmem:[#allocation1] ss:$2 sm:$0xff] %v2426_v42  ;;  %v1312_v2 = vld.sshfl [vmem:[#allocation1 + $0x10] sm:$0xff pattern:$0x75316420] }
 0x367   : > { %1093 = vrot.lane.b32.xlu0 %v1089_v55, %s2105_s13  ;;  %1325 = vst [vmem:[#allocation1 + $0x10] ss:$2 sm:$0xff] %v1270_v52  ;;  %s2058_s13 = scalar_lea.hbm %s2654_s5, 16 }
 0x36d   : > { %v1310_v4 = vld.sshfl [vmem:[#allocation1] sm:$0xff pattern:$0x75316420]  ;;  %v1311_v5 = vld.sshfl [vmem:[#allocation1 + $0x8] sm:$0xff pattern:$0x75316420] }
 0x36e   : > { %1313 = vrot.lane.b32.xlu2 %v1310_v4, %s2108_s16  ;;  %1315 = vrot.lane.b32.xlu1 %v1311_v5, %s2108_s16  ;;  %1323 = vst [vmem:[#allocation1] ss:$2 sm:$0xff] %v2426_v42  ;;  %v1328_v6 = vld.sshfl [vmem:[#allocation1 + $0x10] sm:$0xff pattern:$0x75316420] }
 0x36f   : > { %1299 = vrot.lane.b32.xlu0 %v1294_v62, %s2108_s16  ;;  %1398 = vst [vmem:[#allocation1 + $0x10] ss:$2 sm:$0xff] %v1270_v52 }
 0x375   : > { %v1326_v8 = vld.sshfl [vmem:[#allocation1] sm:$0xff pattern:$0x75316420]  ;;  %v1327_v9 = vld.sshfl [vmem:[#allocation1 + $0x8] sm:$0xff pattern:$0x75316420] }
 0x376   : > { %1329 = vrot.lane.b32.xlu2 %v1326_v8, %s2107_s15  ;;  %1331 = vrot.lane.b32.xlu1 %v1327_v9, %s2107_s15  ;;  %1396 = vst [vmem:[#allocation1] ss:$2 sm:$0xff] %v2426_v42  ;;  %v1401_v10 = vld.sshfl [vmem:[#allocation1 + $0x10] sm:$0xff pattern:$0x75316420] }
 0x377   : > { %1112 = vrot.lane.b32.xlu0 %v1109_v57, %s2106_s14  ;;  %1518 = vst [vmem:[#allocation1 + $0x10] ss:$2 sm:$0xff] %v1513_v7 }
 0x37d   : > { %v1399_v11 = vld.sshfl [vmem:[#allocation1] sm:$0xff pattern:$0x75316420]  ;;  %v1400_v12 = vld.sshfl [vmem:[#allocation1 + $0x8] sm:$0xff pattern:$0x75316420] }
 0x37e   : > { %1402 = vrot.lane.b32.xlu2 %v1399_v11, %s2109_s17  ;;  %1404 = vrot.lane.b32.xlu1 %v1400_v12, %s2109_s17  ;;  %1516 = vst [vmem:[#allocation1] ss:$2 sm:$0xff] %v2426_v42  ;;  %v1521_v15 = vld.sshfl [vmem:[#allocation1 + $0x10] sm:$0xff pattern:$0x75316420] }
 0x37f   : > { %1317 = vrot.lane.b32.xlu0 %v1312_v2, %s2108_s16  ;;  %1534 = vst [vmem:[#allocation1 + $0x10] ss:$2 sm:$0xff] %v1513_v7 }
 0x385   : > { %v1519_v16 = vld.sshfl [vmem:[#allocation1] sm:$0xff pattern:$0x75316420]  ;;  %v1520_v17 = vld.sshfl [vmem:[#allocation1 + $0x8] sm:$0xff pattern:$0x75316420] }
 0x386   : > { %1522 = vrot.lane.b32.xlu2 %v1519_v16, %s2110_s23  ;;  %1524 = vrot.lane.b32.xlu1 %v1520_v17, %s2110_s23  ;;  %1532 = vst [vmem:[#allocation1] ss:$2 sm:$0xff] %v2426_v42  ;;  %v1537_v20 = vld.sshfl [vmem:[#allocation1 + $0x10] sm:$0xff pattern:$0x75316420] }
 0x387   : > { %1333 = vrot.lane.b32.xlu0 %v1328_v6, %s2107_s15  ;;  %1552 = vst [vmem:[#allocation1 + $0x10] ss:$2 sm:$0xff] %v1513_v7  ;;  %s215_s15 = sand.u32 1, %s2092_s19  }
 0x388   : > { %s1882_s16 = sshll.u32 %s215_s15, 3 }
 0x389   : > { %s217_s30 = scalar_lea.vmem [#allocation3], %s1882_s16 }
 0x38a   : > { %s1816_s6 = sshll.u32 %s217_s30, 4  ;;  %s1817_s6 = int_to_ptr.vmem [resolvable:$true] %s1816_s6 }
 0x38d   : > { %v1535_v21 = vld.sshfl [vmem:[#allocation1] sm:$0xff pattern:$0x75316420]  ;;  %v1536_v22 = vld.sshfl [vmem:[#allocation1 + $0x8] sm:$0xff pattern:$0x75316420] }
 0x38e   : > { %1538 = vrot.lane.b32.xlu2 %v1535_v21, %s2111_s25  ;;  %1540 = vrot.lane.b32.xlu1 %v1536_v22, %s2111_s25  ;;  %1550 = vst [vmem:[#allocation1] ss:$2 sm:$0xff] %v2426_v42  ;;  %v1555_v23 = vld.sshfl [vmem:[#allocation1 + $0x10] sm:$0xff pattern:$0x75316420] }
 0x38f   : > { %1406 = vrot.lane.b32.xlu0 %v1401_v10, %s2109_s17  ;;  %1568 = vst [vmem:[#allocation1 + $0x10] ss:$2 sm:$0xff] %v1513_v7  ;;  %v1943_v10 = vld [vmem:[%s2651_s2 + $0xc] sm:$0xf]  ;;  %s1979_s17 = sshll.u32 %s2165_s22, 3  ;;  %s1803_s22 = scalar_lea.sflag [#allocation4], %s215_s15 }
 0x390   : > { %v1064_v29 = vpop.permute.xlu2 %1063 }
 0x395   : > { %v1553_v24 = vld.sshfl [vmem:[#allocation1] sm:$0xff pattern:$0x75316420]  ;;  %v1554_v25 = vld.sshfl [vmem:[#allocation1 + $0x8] sm:$0xff pattern:$0x75316420] }
 0x396   : > { %1556 = vrot.lane.b32.xlu2 %v1553_v24, %s2111_s25  ;;  %1558 = vrot.lane.b32.xlu1 %v1554_v25, %s2111_s25  ;;  %1566 = vst [vmem:[#allocation1] ss:$2 sm:$0xff] %v2426_v42  ;;  %v1571_v18 = vld.sshfl [vmem:[#allocation1 + $0x10] sm:$0xff pattern:$0x75316420] }
 0x397   : > { %1526 = vrot.lane.b32.xlu0 %v1521_v15, %s2110_s23  ;;  %1641 = vst [vmem:[#allocation1 + $0x10] ss:$2 sm:$0xff] %v1513_v7  ;;  %v1948_v25 = vld [vmem:[%s2651_s2 + $0x10] sm:$0xf] }
 0x39d   : > { %v1569_v19 = vld.sshfl [vmem:[#allocation1] sm:$0xff pattern:$0x75316420]  ;;  %v1570_v26 = vld.sshfl [vmem:[#allocation1 + $0x8] sm:$0xff pattern:$0x75316420] }
 0x39e   : > { %1572 = vrot.lane.b32.xlu2 %v1569_v19, %s2110_s23  ;;  %1574 = vrot.lane.b32.xlu1 %v1570_v26, %s2110_s23  ;;  %1639 = vst [vmem:[#allocation1] ss:$2 sm:$0xff] %v2426_v42  ;;  %v1644_v37 = vld.sshfl [vmem:[#allocation1 + $0x10] sm:$0xff pattern:$0x75316420] }
 0x39f   : > { %1542 = vrot.lane.b32.xlu0 %v1537_v20, %s2111_s25 }
 0x3a5   : > { %v1642_v27 = vld.sshfl [vmem:[#allocation1] sm:$0xff pattern:$0x75316420]  ;;  %v1643_v28 = vld.sshfl [vmem:[#allocation1 + $0x8] sm:$0xff pattern:$0x75316420] }
 0x3a6   : > { %1645 = vrot.lane.b32.xlu2 %v1642_v27, %s2112_s26  ;;  %1647 = vrot.lane.b32.xlu1 %v1643_v28, %s2112_s26 }
 0x3a7   : > { %1560 = vrot.lane.b32.xlu0 %v1555_v23, %s2111_s25 }
 0x3a8   : > { %v1066_v30 = vpop.permute.xlu1 %1065 }
 0x3a9   : > { %v1069_v31 = vsel %vm296_vm7, %v1064_v29, %v1066_v30 }
 0x3aa   : > { %v1078_v32 = vsel %vm2284_vm10, %v1069_v31, %v2433_v3  ;;  %v1958_v31 = vld [vmem:[%s2651_s2 + $0x18] sm:$0xf] }
 0x3ab   : > { %1934 = vmatpush.msk.msrb.mxu0 %vm353_vm9, %v1078_v32 }
 0x3ac   : > { %1935 = vmatmul.msk.f32.vlgmr.msrb.gmra.mxu0 %vm349_vm14, %v1103_v44 }
 0x3ae   : > { %1758 = vperm.xlu2 %2032, %v1755_v1  }
 0x3af   : > { %1576 = vrot.lane.b32.xlu0 %v1571_v18, %s2110_s23 }
 0x3b0   : > { %v1115_v36 = vpop.permute.xlu2 %1114 }
 0x3b1   : > { %v1068_v33 = vpop.permute.xlu0 %1067 }
 0x3b2   : > { %v1070_v34 = vsel %vm296_vm7, %v1066_v30, %v1068_v33 }
 0x3b3   : > { %v1079_v35 = vsel %vm2268_vm8, %v1070_v34, %v2435_v47  ;;  %v1929_v47 = vld [vmem:[%s2651_s2 + $0x4] sm:$0xf] }
 0x3b4   : > { %1936 = vmatpush.msk.msrb.mxu1 %vm353_vm9, %v1079_v35 }
 0x3b5   : > { %1937 = vmatmul.msk.f32.vlgmr.msrb.gmra.mxu1 %vm349_vm14, %v1103_v44 }
 0x3b7   : > { %1649 = vrot.lane.b32.xlu0 %v1644_v37, %s2112_s26  ;;  %s1814_s26 = scalar_lea.hbm %s2654_s5, %s1979_s17 }
 0x3b8   : > { %v1280_v38 = vpop.permute.xlu2 %1279  ;;  %s1818_s7 = sshll.u32 %s1814_s26, 4  ;;  %s1819_s7 = int_to_ptr.hbm [resolvable:$true] %s1818_s7 }
 0x3b9   : > { %v1096_v39 = vpop.permute.xlu0 %1095  ;;  %s2052_s8 = sshra.s32 %s1819_s7, 4  ;;  %s2053_s8 = int_to_ptr.hbm [resolvable:$true] %s2052_s8 }
 0x3ba   : > { %s2054_s10 = scalar_lea.hbm %s2053_s8, 8  ;;  %p2059_p0 = scmp.lt.s32.totalorder %s2053_s8, %s2654_s5 }
 0x3bb   : > { %p2055_p11 = scmp.ne.s32.totalorder %s2053_s8, %s2054_s10  ;;  %p2060_p1 = scmp.lt.s32.totalorder %s2058_s13, %s2054_s10 }
 0x3bd   : > { %p2056_p12 = pnand %p2055_p11, %p2182_p5  ;;  %p2061_p2 = por %p2060_p1, %p2059_p0 }
 0x3bf   : > { %p2057_p13 = pneg %p2056_p12 }
 0x3c0   : > { %v1296_v42 = vpop.permute.xlu2 %1295 }
 0x3c1   : > { %v1117_v40 = vpop.permute.xlu1 %1116  ;;  %p2062_p3 = pnand %p2061_p2, %p2057_p13 }
 0x3c2   : > { %v1119_v41 = vsel %vm346_vm11, %v1115_v36, %v1117_v40  ;;  %v1968_v40 = vld [vmem:[%s2651_s2 + $0x20] sm:$0xf] }
 0x3c3   : > { %1932 = vmatpush.msk.msra.mxu3 %vm353_vm9, %v1119_v41 }
 0x3c4   : > { %1933 = vmatmul.msk.f32.vlgmr.msra.gmra.mxu3 %vm349_vm14, %v1929_v47 }
 0x3c8   : > { %v1314_v3 = vpop.permute.xlu2 %1313 }
 0x3c9   : > { %v1284_v43 = vpop.permute.xlu0 %1283 }
 0x3d0   : > { %v1282_v45 = vpop.permute.xlu1 %1281  ;;  %v1330_v58 = vpop.permute.xlu2 %1329 }
 0x3d1   : > { %v1092_v46 = vpop.permute.xlu0 %1091  ;;  %v1285_v51 = vsel %vm2673_vm2, %v1280_v38, %v1282_v45  ;;  %v1286_v62 = vsel %vm2675_vm4, %v1282_v45, %v1284_v43  ;;  %vm2683_vm2 = vcmask 785408   ;;  %vm2686_vm4 = vmmov %vm2682_vm1 }
 0x3d8   : > { %v1298_v48 = vpop.permute.xlu1 %1297  ;;  %v1403_v0 = vpop.permute.xlu2 %1402 }
 0x3d9   : > { %v1301_v52 = vsel %vm2674_vm3, %v1296_v42, %v1298_v48  ;;  %v1094_v53 = vpop.permute.xlu0 %1093 }
 0x3da   : > { %v1305_v55 = vsel %vm2284_vm10, %v1285_v51, %v1301_v52  ;;  %v1098_v56 = vsel %vm296_vm7, %v1094_v53, %v1096_v39  ;;  %v1097_v2 = vsel %vm296_vm7, %v1092_v46, %v1094_v53  ;;  %vm2679_vm7 = vcmask 908288  }
 0x3db   : > { %v1102_v57 = vsel %vm2301_vm13, %v2441_v50, %v1098_v56  ;;  %1944 = vmatpush.msk.msra.mxu0 %vm353_vm9, %v1305_v55  ;;  %v1101_v11 = vsel %vm2297_vm12, %v2439_v49, %v1097_v2  ;;  %v1953_v49 = vld [vmem:[%s2651_s2 + $0x14] sm:$0xf] }
 0x3dc   : > { %1941 = vmatpush.msk.msrb.mxu3 %vm353_vm9, %v1102_v57  ;;  %1945 = vmatmul.msk.f32.vlgmr.msra.gmra.mxu0 %vm349_vm14, %v1943_v10 }
 0x3dd   : > { %1942 = vmatmul.msk.f32.vlgmr.msrb.gmra.mxu3 %vm349_vm14, %v1938_v60 }
 0x3e0   : > { %v1316_v59 = vpop.permute.xlu1 %1315  ;;  %v1523_v12 = vpop.permute.xlu2 %1522 }
 0x3e1   : > { %v1300_v61 = vpop.permute.xlu0 %1299  ;;  %v1319_v5 = vsel %vm2677_vm6, %v1314_v3, %v1316_v59  ;;  %vm2688_vm6 = vmmov %vm2683_vm2 }
 0x3e2   : > { %v1302_v63 = vsel %vm2676_vm5, %v1298_v48, %v1300_v61  ;;  %vm2687_vm5 = vmmov %vm2682_vm1 }
 0x3e3   : > { %v1306_v50 = vsel %vm2268_vm8, %v1286_v62, %v1302_v63 }
 0x3e4   : > { %1946 = vmatpush.msk.msra.mxu1 %vm353_vm9, %v1306_v50 }
 0x3e5   : > { %1947 = vmatmul.msk.f32.vlgmr.msra.gmra.mxu1 %vm349_vm14, %v1943_v10 }
 0x3e8   : > { %v1332_v4 = vpop.permute.xlu1 %1331  ;;  %v1539_v22 = vpop.permute.xlu2 %1538 }
 0x3e9   : > { %v1335_v6 = vsel %vm2678_vm15, %v1330_v58, %v1332_v4  ;;  %v1113_v7 = vpop.permute.xlu0 %1112  ;;  %vm2691_vm15 = vmmov %vm2682_vm1 }
 0x3ea   : > { %v1339_v8 = vsel %vm2297_vm12, %v1319_v5, %v1335_v6  ;;  %v1118_v9 = vsel %vm346_vm11, %v1113_v7, %v1115_v36  ;;  %vm2680_vm11 = vmmov %vm2674_vm3 }
 0x3eb   : > { %1930 = vmatpush.msk.msra.mxu2 %vm353_vm9, %v1118_v9  ;;  %1954 = vmatpush.msk.msrb.mxu0 %vm353_vm9, %v1339_v8  ;;  %vm2684_vm3 = vmmov %vm2679_vm7 }
 0x3ec   : > { %1931 = vmatmul.msk.f32.vlgmr.msra.gmra.mxu2 %vm349_vm14, %v1929_v47  ;;  %1955 = vmatmul.msk.f32.vlgmr.msrb.gmra.mxu0 %vm349_vm14, %v1953_v49 }
 0x3ed   : > { %1939 = vmatpush.msk.msrb.mxu2 %vm353_vm9, %v1101_v11 }
 0x3f0   : > { %v1405_v15 = vpop.permute.xlu1 %1404  ;;  %v1557_v32 = vpop.permute.xlu2 %1556 }
 0x3f1   : > { %v1408_v16 = vsel %vm2679_vm7, %v1403_v0, %v1405_v15  ;;  %v1318_v17 = vpop.permute.xlu0 %1317 }
 0x3f2   : > { %1949 = vmatpush.msk.msra.mxu2 %vm353_vm9, %v1408_v16  ;;  %v1320_v23 = vsel %vm2680_vm11, %v1316_v59, %v1318_v17 }
 0x3f4   : > { %1940 = vmatmul.msk.f32.vlgmr.msrb.gmra.mxu2 %vm349_vm14, %v1938_v60 }
 0x3f8   : > { %v1525_v20 = vpop.permute.xlu1 %1524  ;;  %v1573_v35 = vpop.permute.xlu2 %1572 }
 0x3f9   : > { %v1334_v21 = vpop.permute.xlu0 %1333  ;;  %v1528_v26 = vsel %vm2682_vm1, %v1523_v12, %v1525_v20 }
 0x3fa   : > { %v1336_v24 = vsel %vm2681_vm0, %v1332_v4, %v1334_v21 }
 0x3fb   : > { %v1340_v18 = vsel %vm2301_vm13, %v1320_v23, %v1336_v24 }
 0x3fc   : > { %1956 = vmatpush.msk.msrb.mxu1 %vm353_vm9, %v1340_v18  ;;  %1950 = vmatmul.msk.f32.vlgmr.msra.gmra.mxu2 %vm349_vm14, %v1948_v25 }
 0x3fd   : > { %1957 = vmatmul.msk.f32.vlgmr.msrb.gmra.mxu1 %vm349_vm14, %v1953_v49 }
 0x400   : > { %v1541_v19 = vpop.permute.xlu1 %1540  ;;  %v1646_v45 = vpop.permute.xlu2 %1645 }
 0x401   : > { %v1544_v27 = vsel %vm2683_vm2, %v1539_v22, %v1541_v19  ;;  %v1407_v28 = vpop.permute.xlu0 %1406 }
 0x402   : > { %v1548_v29 = vsel %vm2284_vm10, %v1528_v26, %v1544_v27  ;;  %v1409_v30 = vsel %vm2684_vm3, %v1405_v15, %v1407_v28  ;;  %vm2685_vm10 = vmmov %vm2683_vm2 }
 0x403   : > { %1951 = vmatpush.msk.msra.mxu3 %vm353_vm9, %v1409_v30  ;;  %1959 = vmatpush.msk.msrb.mxu2 %vm353_vm9, %v1548_v29 }
 0x404   : > { %1952 = vmatmul.msk.f32.vlgmr.msra.gmra.mxu3 %vm349_vm14, %v1948_v25  ;;  %1960 = vmatmul.msk.f32.vlgmr.msrb.gmra.mxu2 %vm349_vm14, %v1958_v31 }
 0x408   : > { %v1559_v33 = vpop.permute.xlu1 %1558  ;;  %v1759_v24 = vpop.permute.xlu2 %1758 }
 0x409   : > { %v1527_v34 = vpop.permute.xlu0 %1526  ;;  %v1562_v37 = vsel %vm2685_vm10, %v1557_v32, %v1559_v33 }
 0x40a   : > { %v1529_v41 = vsel %vm2687_vm5, %v1525_v20, %v1527_v34 }
 0x410   : > { %v1575_v36 = vpop.permute.xlu1 %1574 }
 0x411   : > { %v1578_v38 = vsel %vm2686_vm4, %v1573_v35, %v1575_v36  ;;  %v1543_v39 = vpop.permute.xlu0 %1542 }
 0x412   : > { %v1582_v42 = vsel %vm2297_vm12, %v1562_v37, %v1578_v38  ;;  %v1545_v43 = vsel %vm2688_vm6, %v1541_v19, %v1543_v39  ;;  %vm2689_vm12 = vcmask 777216  }
 0x413   : > { %v1549_v44 = vsel %vm2268_vm8, %v1529_v41, %v1545_v43  ;;  %1969 = vmatpush.msk.msra.mxu2 %vm353_vm9, %v1582_v42  ;;  %vm2690_vm8 = vmmov %vm2683_vm2 }
 0x414   : > { %1961 = vmatpush.msk.msrb.mxu3 %vm353_vm9, %v1549_v44  ;;  %1970 = vmatmul.msk.f32.vlgmr.msra.gmra.mxu2 %vm349_vm14, %v1968_v40  ;;  %vm2692_vm7 = vmmov %vm2689_vm12 }
 0x415   : > { %1962 = vmatmul.msk.f32.vlgmr.msrb.gmra.mxu3 %vm349_vm14, %v1958_v31 }
 0x418   : > { %v1648_v46 = vpop.permute.xlu1 %1647 }
 0x419   : > { %v1651_v3 = vsel %vm2689_vm12, %v1646_v45, %v1648_v46  ;;  %v1561_v47 = vpop.permute.xlu0 %1560 }
 0x41a   : > { %1964 = vmatpush.msk.msra.mxu0 %vm353_vm9, %v1651_v3  ;;  %v1563_v48 = vsel %vm2690_vm8, %v1559_v33, %v1561_v47 }
 0x41b   : > { %1965 = vmatmul.msk.f32.vlgmr.msra.gmra.mxu0 %vm349_vm14, %v1963_v13 }
 0x421   : > { %v1577_v54 = vpop.permute.xlu0 %1576 }
 0x422   : > { %v1579_v51 = vsel %vm2691_vm15, %v1575_v36, %v1577_v54 }
 0x423   : > { %v1583_v52 = vsel %vm2301_vm13, %v1563_v48, %v1579_v51 }
 0x424   : > { %1971 = vmatpush.msk.msra.mxu3 %vm353_vm9, %v1583_v52 }
 0x425   : > { %1972 = vmatmul.msk.f32.vlgmr.msra.gmra.mxu3 %vm349_vm14, %v1968_v40 }
 0x429   : > { %v1650_v53 = vpop.permute.xlu0 %1649  ;;  %v1193_v57 = vpop.f32.mrf.mxu0 }
 0x42a   : > { %v1652_v55 = vsel %vm2692_vm7, %v1648_v46, %v1650_v53 }
 0x42b   : > { %1966 = vmatpush.msk.msra.mxu1 %vm353_vm9, %v1652_v55 }
 0x42c   : > { %1967 = vmatmul.msk.f32.vlgmr.msra.gmra.mxu1 %vm349_vm14, %v1963_v13 }
 0x432   : > { %v1213_v62 = vpop.f32.mrf.mxu1 }
 0x447   : > { %v1164_v58 = vpop.f32.mrf.mxu3 }
 0x448   : > { %v1214_v4 = vadd.f32 %v1213_v62, %v1164_v58 }
 0x459   : > { %v1369_v60 = vpop.f32.mrf.mxu0 }
 0x460   : > { %v1264_v14 = vpop.f32.mrf.mxu3 }
 0x461   : > { %v1268_v9 = vadd.f32 %v1264_v14, %v1214_v4 }
 0x462   : > { %v1389_v5 = vpop.f32.mrf.mxu1 }
 0x463   : > { %v1393_v11 = vadd.f32 %v1389_v5, %v1268_v9 }
 0x469   : > { %v1487_v2 = vpop.f32.mrf.mxu0 }
 0x46f   : > { %v1144_v56 = vpop.f32.mrf.mxu2 }
 0x470   : > { %v1194_v61 = vadd.f32 %v1193_v57, %v1144_v56  ;;  %v2037_v57 = vld [vmem:[%s2197_s9] sm:$0xff] }
 0x477   : > { %v1244_v59 = vpop.f32.mrf.mxu2 }
 0x478   : > { %v1267_v50 = vadd.f32 %v1244_v59, %v1194_v61 }
 0x47a   : > { %v1392_v0 = vadd.f32 %v1369_v60, %v1267_v50  ;;  %v1507_v16 = vpop.f32.mrf.mxu1 }
 0x47f   : > { %v1434_v63 = vpop.f32.mrf.mxu2 }
 0x480   : > { %v1457_v7 = vadd.f32 %v1434_v63, %v1392_v0 }
 0x482   : > { %v1510_v10 = vadd.f32 %v1487_v2, %v1457_v7 }
 0x487   : > { %v1454_v6 = vpop.f32.mrf.mxu3  ;;  %v1612_v8 = vpop.f32.mrf.mxu2 }
 0x488   : > { %v1635_v15 = vadd.f32 %v1612_v8, %v1510_v10  ;;  %v1458_v49 = vadd.f32 %v1454_v6, %v1393_v11 }
 0x48a   : > { %v1511_v22 = vadd.f32 %v1507_v16, %v1458_v49 }
 0x497   : > { %v1730_v21 = vpop.f32.mrf.mxu2 }
 0x498   : > { %v1677_v12 = vpop.f32.mrf.mxu0  ;;  %v1632_v17 = vpop.f32.mrf.mxu3 }
 0x499   : > { %v1700_v20 = vadd.f32 %v1677_v12, %v1635_v15  ;;  %v1636_v25 = vadd.f32 %v1632_v17, %v1511_v22 }
 0x49b   : > { %v1753_v23 = vadd.f32 %v1730_v21, %v1700_v20 }
 0x49d   : > { %v1761_v26 = vadd.f32 %v1759_v24, %v1753_v23 }
 0x49f   : > { %v1769_v30 = vmul.f32 %v1761_v26, %v1761_v26  ;;  %v1763_v31 = vsel %vm353_vm9, %v1761_v26, 0.0 }
 0x4a1   : > { %v1771_v1 = vsel %vm353_vm9, %v1769_v30, 0.0 }
 0x4a8   : > { %v1750_v19 = vpop.f32.mrf.mxu3 }
 0x4a9   : > { %v1697_v18 = vpop.f32.mrf.mxu1 }
 0x4aa   : > { %v1701_v27 = vadd.f32 %v1697_v18, %v1636_v25 }
 0x4ac   : > { %v1754_v28 = vadd.f32 %v1750_v19, %v1701_v27 }
 0x4ae   : > { %v1762_v29 = vadd.f32 %v1759_v24, %v1754_v28 }
 0x4b0   : > { %v1764_v32 = vsel %vm353_vm9, %v1762_v29, 0.0  ;;  %v1770_v33 = vmul.f32 %v1762_v29, %v1762_v29 }
 0x4b1   : > { %v1765_v34 = vadd.f32 %v1764_v32, %v1763_v31 }
 0x4b2   : > { %v1772_v35 = vsel %vm353_vm9, %v1770_v33, 0.0 }
 0x4b3   : > { %1766 = vadd.xlane.f32.xlu1 %v1765_v34  ;;  %v1773_v36 = vadd.f32 %v1772_v35, %v1771_v1 }
 0x4b5   : > { %1774 = vadd.xlane.f32.xlu0 %v1773_v36 }
 0x526   : > { %v1767_v37 = vpop.xlane.xlu1 %1766 }
 0x527   : > { %v1768_v38 = vmul.f32 0.00390625, %v1767_v37 }
 0x528   : > { %v1775_v39 = vpop.xlane.xlu0 %1774 }
 0x529   : > { %v1776_v40 = vmul.f32 0.00390625, %v1775_v39  ;;  %v1777_v41 = vmul.f32 %v1768_v38, %v1768_v38  ;;  %v1780_v54 = vsub.f32 %v1762_v29, %v1768_v38  ;;  %v1779_v51 = vsub.f32 %v1761_v26, %v1768_v38 }
 0x52b   : > { %v1778_v42 = vsub.f32 %v1776_v40, %v1777_v41 }
 0x52d   : > { %v1781_v43 = vadd.f32 1e-05, %v1778_v42 }
 0x52f   : > { %2035 = vrsqrt.f32 %v1781_v43  ;;  %vm1788_vm14 = vweird.f32 %v1781_v43 }
 0x535   : > { %v2036_v44 = vpop.eup %2035 }
 0x536   : > { %v1783_v45 = vmul.f32 %v2036_v44, %v1781_v43  ;;  %vm1789_vm13 = vweird.f32 %v2036_v44 }
 0x537   : > { %vm1790_vm11 = vmor %vm1788_vm14, %vm1789_vm13 }
 0x538   : > { %v1784_v46 = vmul.f32 %v2036_v44, %v1783_v45 }
 0x53a   : > { %v1785_v13 = vmul.f32 0.5, %v1784_v46 }
 0x53c   : > { %v1786_v3 = vsub.f32 1.5, %v1785_v13 }
 0x53e   : > { %v1787_v47 = vmul.f32 %v2036_v44, %v1786_v3 }
 0x540   : > { %v1791_v48 = vsel %vm1790_vm11, %v2036_v44, %v1787_v47 }
 0x541   : > { %v1793_v52 = vmul.f32 %v1791_v48, %v1780_v54  ;;  %v1792_v53 = vmul.f32 %v1791_v48, %v1779_v51 }
 0x543   : > { %v1796_v55 = vrot.slane %v1793_v52, 4 }
 0x545   : > { %v1797_v56 = vsel %vm353_vm9, %v1792_v53, %v1796_v55 }
 0x546   : > { %v1799_v58 = vadd.f32 %v2037_v57, %v1797_v56 }
 0x548   : > { %v1800_v59 = vmax.f32 %v1799_v58, 0.0 }
 0x54a   : > { %1801 = vst [vmem:[%s217_s30] sm:$0xff] %v1800_v59 }
 0x54b   : > { %2065 = shalt.err (!%p2062_p3)
}
 0x54c   : > { %1980 = dma.vmem_to_hbm [thread:$0]  (%p2182_p5), %s1817_s6, 128, %s1819_s7, %s1803_s22  }
 0x54d PF: > { %p1986_p4 = scmp.ge.s32.totalorder %s2100_s21, 2  ;;  %s1830_s9 = sand.u32 1, %s2088_s18  }
 0x54e   : > { %s1831_s15 = scalar_lea.sflag [#allocation4], %s1830_s9 }
 0x54f   : > { %p1983_p7 = pnand %p1986_p4, %p2186_p6 }
 0x551   : > { %p1984_p8 = pneg %p1983_p7 }
 0x553   : > { %2083 = dma.done.wait (%p1984_p8), %s1831_s15, 128  }
 0x554   : > { %2085 = vsyncadd (%p1984_p8), %s1831_s15, 4294967168  ;;  %p15_p9 = scmp.ge.s32.totalorder %s2169_s24, 4   ;;  %s2693_s18 = smov %s2092_s19 }
 0x555   : > { %s2694_s19 = smov %s2096_s20  ;;  %s2695_s20 = smov %s2180_s27 }
 0x556   : > { %s2696_s21 = smov %s2169_s24  ;;  %17 = sbr.rel (!%p15_p9) target bundleno = 3 (0x3), region = 117 }
 0x55b   :  { %1837 = vsyncpa [#allocation4], 1 }
 0x55c   :  { %1839 = vsyncpa [#allocation4 + $0x1], 1 }

</bundles_post_ra>
